<compile_context>
chip_gen: v7x
topology: tpu7x:2x2x1
jax: 0.10.0
libtpu: 0.0.40
codegen_flags: <defaults>
</compile_context>

<pallas_src>
import functools

import jax
import jax.numpy as jnp
from jax.experimental import pallas as pl
from jax.experimental.pallas import tpu as pltpu


def _round_up(a, m):
    return (a + m - 1) // m * m


def _cdiv(a, b):
    return (a + b - 1) // b


def _ff_kernel(x_ref, w1_ref, b1_ref, w2_ref, b2_ref, g_ref, beta_ref, o_ref,
               y_acc, x_bf, *, eps, n_valid):
    """Grid = (row-tile i [parallel], hidden-chunk k [arbitrary/reduction])."""
    k = pl.program_id(1)

    @pl.when(k == 0)
    def _init():
        y_acc[...] = jnp.zeros_like(y_acc)
        # Hoisted f32 -> bf16 cast of the x tile; reused by every hidden chunk.
        x_bf[...] = x_ref[...].astype(jnp.bfloat16)

    # Linear 1 (bf16 operands, f32 accumulate) + bias + ReLU for this hidden
    # chunk, then accumulate its Linear-2 contribution into the f32 scratch.
    # Elementwise bias/ReLU stay in f32 (v5e has no bf16 VPU path).
    h = jnp.dot(x_bf[...], w1_ref[...], preferred_element_type=jnp.float32)
    h = jnp.maximum(h + b1_ref[...], 0.0).astype(jnp.bfloat16)
    y_acc[...] += jnp.dot(h, w2_ref[...], preferred_element_type=jnp.float32)

    # Dropout(p) layers are identity in eval mode.

    @pl.when(k == pl.num_programs(1) - 1)
    def _finalize():
        xf = x_ref[...].astype(jnp.float32)
        z = xf + y_acc[...] + b2_ref[...]          # residual + second bias
        c_pad = z.shape[-1]
        inv_n = 1.0 / float(n_valid)
        mean = jnp.sum(z, axis=-1, keepdims=True) * inv_n
        cen = z - mean
        if n_valid == c_pad:
            # Lane dim fully valid: plain LayerNorm over the last dim.
            var = jnp.sum(cen * cen, axis=-1, keepdims=True) * inv_n
        else:
            # C was padded to a multiple of 128. Padded lanes of z are exactly
            # zero (x, the W2 output columns and b2 are all zero-padded), so
            # unmasked moments divided by n_valid are exact - no iota / mask /
            # selects needed. Padded output lanes are zeroed by the
            # zero-padded gamma/beta and sliced off in the wrapper.
            ex2 = jnp.sum(z * z, axis=-1, keepdims=True) * inv_n
            var = jnp.maximum(ex2 - mean * mean, 0.0)
        normed = cen * jax.lax.rsqrt(var + eps)
        o_ref[...] = (normed * g_ref[...] + beta_ref[...]).astype(o_ref.dtype)


def feed_forward(x, w1, b1, w2, b2, gamma, beta, *, eps=1e-5,
                 tile_rows=None, h_chunk=None):
    """x: (B, T, C). Returns (B, T, C) = LayerNorm(x + Linear(ReLU(Linear(x)))).

    Weights are stored as (in, out): w1 (C, 4C), w2 (4C, C); equivalent to the
    PyTorch module's x @ W.T with W of shape (out, in).
    """
    B, T, C = x.shape
    Cin, H = w1.shape
    assert Cin == C and w2.shape == (H, C)
    assert b1.shape == (H,) and b2.shape == (C,)
    assert gamma.shape == (C,) and beta.shape == (C,)

    rows = B * T
    itemsize = jnp.dtype(x.dtype).itemsize
    C_pad = _round_up(C, 128)
    H_pad128 = _round_up(H, 128)
    units = H_pad128 // 128

    # --- generation-aware VMEM budget --------------------------------------
    try:
        vmem_cap = int(pltpu.get_tpu_info().vmem_capacity_bytes)
    except Exception:
        vmem_cap = 0
    if vmem_cap <= (16 << 20):
        vmem_cap = 64 << 20          # conservative fallback (v7x per-TC VMEM)
    vmem_budget = max(vmem_cap // 2, vmem_cap - (16 << 20))

    def vmem_need(tr, hc):
        return (2 * 2 * C_pad * hc * 2             # W1 + W2 chunks (bf16, 2x buffered)
                + 2 * 2 * tr * C_pad * itemsize    # x tile + out tile (2x buffered)
                + tr * C_pad * 4                   # f32 y accumulator scratch
                + tr * C_pad * 2                   # bf16 x scratch
                + tr * hc * 6                      # (tr, hc) intermediate (f32 + bf16)
                + 2 * 2 * (hc + 3 * C_pad) * 4)    # b1 chunk, b2, gamma, beta

    # --- row tile -----------------------------------------------------------
    if tile_rows is None:
        # Streamed-weight arithmetic intensity ~= tile_rows FLOPs/byte; 512 is
        # comfortably above the v5e/v7x rooflines and near v6e's (~640).
        tile_rows = 512
    tile_rows = max(8, min((tile_rows // 8) * 8, _round_up(rows, 8)))

    # --- hidden-dim chunking (exact tiling of H_pad128) ---------------------
    auto_h = h_chunk is None
    resident = auto_h and vmem_need(tile_rows, H_pad128) <= vmem_budget
    if resident:
        # Whole bf16 weight set fits VMEM: single k step + constant weight
        # block index -> weights are fetched once and stay resident across
        # all row tiles (no per-row-tile re-streaming).
        cu, n_h = units, 1
    else:
        def exact_cu(cu_req):
            cu_req = max(1, min(cu_req, units))
            n = _cdiv(units, cu_req)
            return _cdiv(units, n), n

        cu, n_h = exact_cu((2048 if auto_h else max(128, int(h_chunk))) // 128)
        for _ in range(64):
            if vmem_need(tile_rows, cu * 128) <= vmem_budget:
                break
            if cu > 1:                       # shrink h_chunk first (v7x advice)
                cu, n_h = exact_cu(cu // 2)
            elif tile_rows > 8:              # only then shrink the row tile
                tile_rows = max(8, ((tile_rows // 2) // 8) * 8)
            else:
                break
    h_chunk_eff = cu * 128
    H_pad = n_h * h_chunk_eff

    # --- v7x megacore: keep >= 2 tiles on the parallel row axis -------------
    rows_pad8 = _round_up(rows, 8)
    if resident and rows_pad8 >= 16 and tile_rows >= rows_pad8:
        tile_rows = max(8, ((rows_pad8 // 2) // 8) * 8)

    rows_pad = _round_up(rows, tile_rows)
    n_row_tiles = rows_pad // tile_rows

    # --- pad operands to lane/sublane-aligned shapes ------------------------
    x2d = x.reshape(rows, C)
    if rows_pad != rows or C_pad != C:
        x2d = jnp.pad(x2d, ((0, rows_pad - rows), (0, C_pad - C)))
    w1p = jnp.pad(w1, ((0, C_pad - C), (0, H_pad - H))).astype(jnp.bfloat16)
    w2p = jnp.pad(w2, ((0, H_pad - H), (0, C_pad - C))).astype(jnp.bfloat16)
    b1_2d = jnp.pad(b1, (0, H_pad - H)).reshape(1, H_pad).astype(jnp.float32)
    b2_2d = jnp.pad(b2, (0, C_pad - C)).reshape(1, C_pad).astype(jnp.float32)
    g_2d = jnp.pad(gamma, (0, C_pad - C)).reshape(1, C_pad).astype(jnp.float32)
    beta_2d = jnp.pad(beta, (0, C_pad - C)).reshape(1, C_pad).astype(jnp.float32)

    need = vmem_need(tile_rows, h_chunk_eff)
    vmem_limit = int(min(vmem_cap, max(need + (12 << 20), 32 << 20)))

    weight_passes = 1 if resident else n_row_tiles
    cost = pl.CostEstimate(
        flops=int(4 * rows_pad * C_pad * H_pad),      # 2 matmuls * 2*M*N*K
        transcendentals=int(rows_pad),                # one rsqrt per row
        bytes_accessed=int(2 * rows_pad * C_pad * itemsize
                           + weight_passes * 2 * C_pad * H_pad * 2
                           + (H_pad + 3 * C_pad) * 4),
    )

    def _build(single_buffer_weights):
        def w_spec(shape, index_map):
            if single_buffer_weights:
                # Constant block index + single buffer: weights stay resident
                # in one VMEM copy across the whole grid.
                return pl.BlockSpec(shape, index_map, pipeline_mode=pl.Buffered(1))
            return pl.BlockSpec(shape, index_map)

        return pl.pallas_call(
            functools.partial(_ff_kernel, eps=eps, n_valid=C),
            out_shape=jax.ShapeDtypeStruct((rows_pad, C_pad), x.dtype),
            grid_spec=pltpu.PrefetchScalarGridSpec(
                num_scalar_prefetch=0,
                grid=(n_row_tiles, n_h),
                in_specs=[
                    pl.BlockSpec((tile_rows, C_pad), lambda i, k: (i, 0)),   # x rows
                    w_spec((C_pad, h_chunk_eff), lambda i, k: (0, k)),       # W1 chunk
                    pl.BlockSpec((1, h_chunk_eff), lambda i, k: (0, k)),     # b1 chunk
                    w_spec((h_chunk_eff, C_pad), lambda i, k: (k, 0)),       # W2 chunk
                    pl.BlockSpec((1, C_pad), lambda i, k: (0, 0)),           # b2
                    pl.BlockSpec((1, C_pad), lambda i, k: (0, 0)),           # gamma
                    pl.BlockSpec((1, C_pad), lambda i, k: (0, 0)),           # beta
                ],
                out_specs=pl.BlockSpec((tile_rows, C_pad), lambda i, k: (i, 0)),
                scratch_shapes=[
                    pltpu.VMEM((tile_rows, C_pad), jnp.float32),    # y accumulator
                    pltpu.VMEM((tile_rows, C_pad), jnp.bfloat16),   # hoisted bf16 x
                ],
            ),
            compiler_params=pltpu.CompilerParams(
                dimension_semantics=("parallel", "arbitrary"),
                vmem_limit_bytes=vmem_limit,
            ),
            cost_estimate=cost,
        )

    args = (x2d, w1p, b1_2d, w2p, b2_2d, g_2d, beta_2d)
    if resident and hasattr(pl, "Buffered"):
        try:
            out2d = _build(True)(*args)
        except Exception:
            # Fall back to default double-buffered weight specs if Buffered(1)
            # is not supported by this Pallas/Mosaic version.
            out2d = _build(False)(*args)
    else:
        out2d = _build(False)(*args)

    return out2d[:rows, :C].reshape(B, T, C)


def _reference(x, w1, b1, w2, b2, gamma, beta, eps=1e-5):
    # Mirror the kernel's bf16-operand / f32-accumulation matmuls.
    xb = x.astype(jnp.bfloat16)
    h = jnp.dot(xb, w1.astype(jnp.bfloat16), preferred_element_type=jnp.float32) + b1
    h = jnp.maximum(h, 0.0).astype(jnp.bfloat16)
    y = jnp.dot(h, w2.astype(jnp.bfloat16), preferred_element_type=jnp.float32) + b2
    z = x.astype(jnp.float32) + y
    mean = jnp.mean(z, axis=-1, keepdims=True)
    var = jnp.mean((z - mean) ** 2, axis=-1, keepdims=True)
    return ((z - mean) * jax.lax.rsqrt(var + eps) * gamma + beta).astype(x.dtype)


def _run_case(key, B, T, C, **kw):
    H = 4 * C
    k_x, k_w1, k_b1, k_w2, k_b2, k_g, k_be = jax.random.split(key, 7)
    x = jax.random.normal(k_x, (B, T, C), dtype=jnp.float32)
    w1 = jax.random.normal(k_w1, (C, H), dtype=jnp.float32) * (1.0 / jnp.sqrt(C))
    b1 = jax.random.normal(k_b1, (H,), dtype=jnp.float32) * 0.01
    w2 = jax.random.normal(k_w2, (H, C), dtype=jnp.float32) * (1.0 / jnp.sqrt(H))
    b2 = jax.random.normal(k_b2, (C,), dtype=jnp.float32) * 0.01
    gamma = 1.0 + 0.1 * jax.random.normal(k_g, (C,), dtype=jnp.float32)
    beta = 0.1 * jax.random.normal(k_be, (C,), dtype=jnp.float32)

    out = feed_forward(x, w1, b1, w2, b2, gamma, beta, **kw)
    out = jax.block_until_ready(out)

    ref = _reference(x, w1, b1, w2, b2, gamma, beta)
    assert out.shape == (B, T, C)
    assert jnp.allclose(out, ref, atol=2e-2, rtol=2e-2), (
        f"mismatch vs reference (B={B}, T={T}, C={C}): "
        f"max abs err {float(jnp.max(jnp.abs(out - ref)))}")


if __name__ == "__main__":
    key = jax.random.PRNGKey(0)
    k1, k2, k3, k4 = jax.random.split(key, 4)

    # 1) Lane-aligned C: weight-resident fast path, >=2 row tiles (megacore).
    _run_case(k1, B=2, T=8, C=128)
    # 2) Small, non-lane-aligned C: exercises C padding + padded-lane LayerNorm.
    _run_case(k2, B=2, T=8, C=32)
    # 3) Forced streamed-weight path: multi H-chunk accumulation, grid (2, 2).
    _run_case(k3, B=2, T=64, C=128, tile_rows=64, h_chunk=256)
    # 4) Ragged rows (B*T not a multiple of 8) + padded C.
    _run_case(k4, B=3, T=5, C=64)

    print("KERNEL_OK")
</pallas_src>

<mosaic_0001>
module attributes {stable_mosaic.version = 11 : i64} {
  func.func @_ff_kernel(%arg0: i32, %arg1: i32, %arg2: memref<8x128xf32, #tpu.memory_space<vmem>>, %arg3: memref<128x512xbf16, #tpu.memory_space<vmem>>, %arg4: memref<1x512xf32, #tpu.memory_space<vmem>>, %arg5: memref<512x128xbf16, #tpu.memory_space<vmem>>, %arg6: memref<1x128xf32, #tpu.memory_space<vmem>>, %arg7: memref<1x128xf32, #tpu.memory_space<vmem>>, %arg8: memref<1x128xf32, #tpu.memory_space<vmem>>, %arg9: memref<8x128xf32, #tpu.memory_space<vmem>>, %arg10: memref<8x128xf32, #tpu.memory_space<vmem>>, %arg11: memref<8x128xbf16, #tpu.memory_space<vmem>>) attributes {dimension_semantics = [#tpu.dimension_semantics<parallel>, #tpu.dimension_semantics<arbitrary>], iteration_bounds = array<i64: 2, 1>, scalar_prefetch = 0 : i64, scratch_operands = 2 : i64, tpu.core_type = #tpu.core_type<tc>, window_params = [{transform_indices = @transform_0, window_bounds = array<i64: 8, 128>}, {pipeline_mode = #tpu.pipeline_mode<synchronous>, transform_indices = @transform_1, window_bounds = array<i64: 128, 512>}, {transform_indices = @transform_2, window_bounds = array<i64: 1, 512>}, {pipeline_mode = #tpu.pipeline_mode<synchronous>, transform_indices = @transform_3, window_bounds = array<i64: 512, 128>}, {pipeline_mode = #tpu.pipeline_mode<synchronous>, transform_indices = @transform_4, window_bounds = array<i64: 1, 128>}, {pipeline_mode = #tpu.pipeline_mode<synchronous>, transform_indices = @transform_5, window_bounds = array<i64: 1, 128>}, {pipeline_mode = #tpu.pipeline_mode<synchronous>, transform_indices = @transform_6, window_bounds = array<i64: 1, 128>}, {transform_indices = @transform_7, window_bounds = array<i64: 8, 128>}]} {
    %c0_i32 = arith.constant 0 : i32
    %0 = arith.cmpi eq, %arg1, %c0_i32 : i32
    %1 = arith.extui %0 : i1 to i32
    %c0_i32_0 = arith.constant 0 : i32
    %2 = arith.cmpi ne, %1, %c0_i32_0 : i32
    scf.if %2 {
      %cst_16 = arith.constant 0.000000e+00 : f32
      %20 = vector.broadcast %cst_16 : f32 to vector<8x128xf32>
      %c0_17 = arith.constant 0 : index
      %c0_18 = arith.constant 0 : index
      %21 = vector.load %arg10[%c0_17, %c0_18] : memref<8x128xf32, #tpu.memory_space<vmem>>, vector<8x128xf32>
      tpu.vector_store %arg10[%c0_17, %c0_18], %20 {strides = array<i32>} : memref<8x128xf32, #tpu.memory_space<vmem>>, vector<8x128xf32>,
      %c0_19 = arith.constant 0 : index
      %c0_20 = arith.constant 0 : index
      %22 = vector.load %arg2[%c0_19, %c0_20] : memref<8x128xf32, #tpu.memory_space<vmem>>, vector<8x128xf32>
      %23 = arith.truncf %22 : vector<8x128xf32> to vector<8x128xbf16>
      %c0_21 = arith.constant 0 : index
      %c0_22 = arith.constant 0 : index
      %24 = vector.load %arg11[%c0_21, %c0_22] : memref<8x128xbf16, #tpu.memory_space<vmem>>, vector<8x128xbf16>
      tpu.vector_store %arg11[%c0_21, %c0_22], %23 {strides = array<i32>} : memref<8x128xbf16, #tpu.memory_space<vmem>>, vector<8x128xbf16>,
    } else {
    }
    %c0 = arith.constant 0 : index
    %c0_1 = arith.constant 0 : index
    %3 = vector.load %arg11[%c0, %c0_1] : memref<8x128xbf16, #tpu.memory_space<vmem>>, vector<8x128xbf16>
    %c0_2 = arith.constant 0 : index
    %c0_3 = arith.constant 0 : index
    %4 = vector.load %arg3[%c0_2, %c0_3] : memref<128x512xbf16, #tpu.memory_space<vmem>>, vector<128x512xbf16>
    %cst = arith.constant dense<0.000000e+00> : vector<8x512xf32>
    %5 = tpu.matmul %3, %4, %cst {dimension_numbers = #tpu.dot_dimension_numbers<[1], [0], [0], [1], [0, 0, 1, 1], [], []>} : vector<8x128xbf16>, vector<128x512xbf16>, vector<8x512xf32> -> vector<8x512xf32>
    %c0_4 = arith.constant 0 : index
    %c0_5 = arith.constant 0 : index
    %6 = vector.load %arg4[%c0_4, %c0_5] : memref<1x512xf32, #tpu.memory_space<vmem>>, vector<1x512xf32>
    %7 = vector.broadcast %6 : vector<1x512xf32> to vector<8x512xf32>
    %8 = arith.addf %5, %7 : vector<8x512xf32>
    %cst_6 = arith.constant 0.000000e+00 : f32
    %9 = vector.broadcast %cst_6 : f32 to vector<8x512xf32>
    %10 = arith.maximumf %8, %9 : vector<8x512xf32>
    %11 = arith.truncf %10 : vector<8x512xf32> to vector<8x512xbf16>
    %c0_7 = arith.constant 0 : index
    %c0_8 = arith.constant 0 : index
    %12 = vector.load %arg10[%c0_7, %c0_8] : memref<8x128xf32, #tpu.memory_space<vmem>>, vector<8x128xf32>
    %c0_9 = arith.constant 0 : index
    %c0_10 = arith.constant 0 : index
    %13 = vector.load %arg5[%c0_9, %c0_10] : memref<512x128xbf16, #tpu.memory_space<vmem>>, vector<512x128xbf16>
    %cst_11 = arith.constant dense<0.000000e+00> : vector<8x128xf32>
    %14 = tpu.matmul %11, %13, %cst_11 {dimension_numbers = #tpu.dot_dimension_numbers<[1], [0], [0], [1], [0, 0, 1, 1], [], []>} : vector<8x512xbf16>, vector<512x128xbf16>, vector<8x128xf32> -> vector<8x128xf32>
    %15 = arith.addf %12, %14 : vector<8x128xf32>
    %c0_12 = arith.constant 0 : index
    %c0_13 = arith.constant 0 : index
    %16 = vector.load %arg10[%c0_12, %c0_13] : memref<8x128xf32, #tpu.memory_space<vmem>>, vector<8x128xf32>
    tpu.vector_store %arg10[%c0_12, %c0_13], %15 {strides = array<i32>} : memref<8x128xf32, #tpu.memory_space<vmem>>, vector<8x128xf32>,
    %c0_i32_14 = arith.constant 0 : i32
    %17 = arith.cmpi eq, %arg1, %c0_i32_14 : i32
    %18 = arith.extui %17 : i1 to i32
    %c0_i32_15 = arith.constant 0 : i32
    %19 = arith.cmpi ne, %18, %c0_i32_15 : i32
    scf.if %19 {
      %c0_16 = arith.constant 0 : index
      %c0_17 = arith.constant 0 : index
      %20 = vector.load %arg2[%c0_16, %c0_17] : memref<8x128xf32, #tpu.memory_space<vmem>>, vector<8x128xf32>
      %c0_18 = arith.constant 0 : index
      %c0_19 = arith.constant 0 : index
      %21 = vector.load %arg10[%c0_18, %c0_19] : memref<8x128xf32, #tpu.memory_space<vmem>>, vector<8x128xf32>
      %22 = arith.addf %20, %21 : vector<8x128xf32>
      %c0_20 = arith.constant 0 : index
      %c0_21 = arith.constant 0 : index
      %23 = vector.load %arg6[%c0_20, %c0_21] : memref<1x128xf32, #tpu.memory_space<vmem>>, vector<1x128xf32>
      %24 = vector.broadcast %23 : vector<1x128xf32> to vector<8x128xf32>
      %25 = arith.addf %22, %24 : vector<8x128xf32>
      %cst_22 = arith.constant dense<0.000000e+00> : vector<8xf32>
      %26 = vector.multi_reduction <add>, %25, %cst_22 [1] : vector<8x128xf32> to vector<8xf32>
      %27 = vector.shape_cast %26 : vector<8xf32> to vector<8x1xf32>
      %cst_23 = arith.constant 7.812500e-03 : f32
      %28 = vector.broadcast %cst_23 : f32 to vector<8x1xf32>
      %29 = arith.mulf %27, %28 : vector<8x1xf32>
      %30 = vector.broadcast %29 : vector<8x1xf32> to vector<8x128xf32>
      %31 = arith.subf %25, %30 : vector<8x128xf32>
      %32 = arith.mulf %31, %31 : vector<8x128xf32>
      %cst_24 = arith.constant dense<0.000000e+00> : vector<8xf32>
      %33 = vector.multi_reduction <add>, %32, %cst_24 [1] : vector<8x128xf32> to vector<8xf32>
      %34 = vector.shape_cast %33 : vector<8xf32> to vector<8x1xf32>
      %cst_25 = arith.constant 7.812500e-03 : f32
      %35 = vector.broadcast %cst_25 : f32 to vector<8x1xf32>
      %36 = arith.mulf %34, %35 : vector<8x1xf32>
      %cst_26 = arith.constant 9.99999974E-6 : f32
      %37 = vector.broadcast %cst_26 : f32 to vector<8x1xf32>
      %38 = arith.addf %36, %37 : vector<8x1xf32>
      %39 = math.rsqrt %38 : vector<8x1xf32>
      %40 = vector.broadcast %39 : vector<8x1xf32> to vector<8x128xf32>
      %41 = arith.mulf %31, %40 : vector<8x128xf32>
      %c0_27 = arith.constant 0 : index
      %c0_28 = arith.constant 0 : index
      %42 = vector.load %arg7[%c0_27, %c0_28] : memref<1x128xf32, #tpu.memory_space<vmem>>, vector<1x128xf32>
      %43 = vector.broadcast %42 : vector<1x128xf32> to vector<8x128xf32>
      %44 = arith.mulf %41, %43 : vector<8x128xf32>
      %c0_29 = arith.constant 0 : index
      %c0_30 = arith.constant 0 : index
      %45 = vector.load %arg8[%c0_29, %c0_30] : memref<1x128xf32, #tpu.memory_space<vmem>>, vector<1x128xf32>
      %46 = vector.broadcast %45 : vector<1x128xf32> to vector<8x128xf32>
      %47 = arith.addf %44, %46 : vector<8x128xf32>
      %c0_31 = arith.constant 0 : index
      %c0_32 = arith.constant 0 : index
      %48 = vector.load %arg9[%c0_31, %c0_32] : memref<8x128xf32, #tpu.memory_space<vmem>>, vector<8x128xf32>
      tpu.vector_store %arg9[%c0_31, %c0_32], %47 {strides = array<i32>} : memref<8x128xf32, #tpu.memory_space<vmem>>, vector<8x128xf32>,
    } else {
    }
    return
  }
  func.func @transform_0(%arg0: i32, %arg1: i32) -> (i32, i32) {
    %c0_i32 = arith.constant 0 : i32
    %c0_i32_0 = arith.constant 0 : i32
    return %arg0, %c0_i32 : i32, i32
  }
  func.func @transform_1(%arg0: i32, %arg1: i32) -> (i32, i32) {
    %c0_i32 = arith.constant 0 : i32
    %c0_i32_0 = arith.constant 0 : i32
    return %c0_i32, %arg1 : i32, i32
  }
  func.func @transform_2(%arg0: i32, %arg1: i32) -> (i32, i32) {
    %c0_i32 = arith.constant 0 : i32
    %c0_i32_0 = arith.constant 0 : i32
    return %c0_i32, %arg1 : i32, i32
  }
  func.func @transform_3(%arg0: i32, %arg1: i32) -> (i32, i32) {
    %c0_i32 = arith.constant 0 : i32
    %c0_i32_0 = arith.constant 0 : i32
    return %arg1, %c0_i32 : i32, i32
  }
  func.func @transform_4(%arg0: i32, %arg1: i32) -> (i32, i32) {
    %c0_i32 = arith.constant 0 : i32
    %c0_i32_0 = arith.constant 0 : i32
    %c0_i32_1 = arith.constant 0 : i32
    return %c0_i32, %c0_i32_0 : i32, i32
  }
  func.func @transform_5(%arg0: i32, %arg1: i32) -> (i32, i32) {
    %c0_i32 = arith.constant 0 : i32
    %c0_i32_0 = arith.constant 0 : i32
    %c0_i32_1 = arith.constant 0 : i32
    return %c0_i32, %c0_i32_0 : i32, i32
  }
  func.func @transform_6(%arg0: i32, %arg1: i32) -> (i32, i32) {
    %c0_i32 = arith.constant 0 : i32
    %c0_i32_0 = arith.constant 0 : i32
    %c0_i32_1 = arith.constant 0 : i32
    return %c0_i32, %c0_i32_0 : i32, i32
  }
  func.func @transform_7(%arg0: i32, %arg1: i32) -> (i32, i32) {
    %c0_i32 = arith.constant 0 : i32
    %c0_i32_0 = arith.constant 0 : i32
    return %arg0, %c0_i32 : i32, i32
  }
}

module attributes {stable_mosaic.version = 11 : i64} {
  func.func @_ff_kernel(%arg0: i32, %arg1: i32, %arg2: memref<8x128xf32, #tpu.memory_space<vmem>>, %arg3: memref<128x512xbf16, #tpu.memory_space<vmem>>, %arg4: memref<1x512xf32, #tpu.memory_space<vmem>>, %arg5: memref<512x128xbf16, #tpu.memory_space<vmem>>, %arg6: memref<1x128xf32, #tpu.memory_space<vmem>>, %arg7: memref<1x128xf32, #tpu.memory_space<vmem>>, %arg8: memref<1x128xf32, #tpu.memory_space<vmem>>, %arg9: memref<8x128xf32, #tpu.memory_space<vmem>>, %arg10: memref<8x128xf32, #tpu.memory_space<vmem>>, %arg11: memref<8x128xbf16, #tpu.memory_space<vmem>>) attributes {dimension_semantics = [#tpu.dimension_semantics<parallel>, #tpu.dimension_semantics<arbitrary>], iteration_bounds = array<i64: 2, 1>, scalar_prefetch = 0 : i64, scratch_operands = 2 : i64, tpu.core_type = #tpu.core_type<tc>, window_params = [{transform_indices = @transform_0, window_bounds = array<i64: 8, 128>}, {transform_indices = @transform_1, window_bounds = array<i64: 128, 512>}, {transform_indices = @transform_2, window_bounds = array<i64: 1, 512>}, {transform_indices = @transform_3, window_bounds = array<i64: 512, 128>}, {pipeline_mode = #tpu.pipeline_mode<synchronous>, transform_indices = @transform_4, window_bounds = array<i64: 1, 128>}, {pipeline_mode = #tpu.pipeline_mode<synchronous>, transform_indices = @transform_5, window_bounds = array<i64: 1, 128>}, {pipeline_mode = #tpu.pipeline_mode<synchronous>, transform_indices = @transform_6, window_bounds = array<i64: 1, 128>}, {transform_indices = @transform_7, window_bounds = array<i64: 8, 128>}]} {
    %c0_i32 = arith.constant 0 : i32
    %0 = arith.cmpi eq, %arg1, %c0_i32 : i32
    %1 = arith.extui %0 : i1 to i32
    %c0_i32_0 = arith.constant 0 : i32
    %2 = arith.cmpi ne, %1, %c0_i32_0 : i32
    scf.if %2 {
      %cst_16 = arith.constant 0.000000e+00 : f32
      %20 = vector.broadcast %cst_16 : f32 to vector<8x128xf32>
      %c0_17 = arith.constant 0 : index
      %c0_18 = arith.constant 0 : index
      %21 = vector.load %arg10[%c0_17, %c0_18] : memref<8x128xf32, #tpu.memory_space<vmem>>, vector<8x128xf32>
      tpu.vector_store %arg10[%c0_17, %c0_18], %20 {strides = array<i32>} : memref<8x128xf32, #tpu.memory_space<vmem>>, vector<8x128xf32>,
      %c0_19 = arith.constant 0 : index
      %c0_20 = arith.constant 0 : index
      %22 = vector.load %arg2[%c0_19, %c0_20] : memref<8x128xf32, #tpu.memory_space<vmem>>, vector<8x128xf32>
      %23 = arith.truncf %22 : vector<8x128xf32> to vector<8x128xbf16>
      %c0_21 = arith.constant 0 : index
      %c0_22 = arith.constant 0 : index
      %24 = vector.load %arg11[%c0_21, %c0_22] : memref<8x128xbf16, #tpu.memory_space<vmem>>, vector<8x128xbf16>
      tpu.vector_store %arg11[%c0_21, %c0_22], %23 {strides = array<i32>} : memref<8x128xbf16, #tpu.memory_space<vmem>>, vector<8x128xbf16>,
    } else {
    }
    %c0 = arith.constant 0 : index
    %c0_1 = arith.constant 0 : index
    %3 = vector.load %arg11[%c0, %c0_1] : memref<8x128xbf16, #tpu.memory_space<vmem>>, vector<8x128xbf16>
    %c0_2 = arith.constant 0 : index
    %c0_3 = arith.constant 0 : index
    %4 = vector.load %arg3[%c0_2, %c0_3] : memref<128x512xbf16, #tpu.memory_space<vmem>>, vector<128x512xbf16>
    %cst = arith.constant dense<0.000000e+00> : vector<8x512xf32>
    %5 = tpu.matmul %3, %4, %cst {dimension_numbers = #tpu.dot_dimension_numbers<[1], [0], [0], [1], [0, 0, 1, 1], [], []>} : vector<8x128xbf16>, vector<128x512xbf16>, vector<8x512xf32> -> vector<8x512xf32>
    %c0_4 = arith.constant 0 : index
    %c0_5 = arith.constant 0 : index
    %6 = vector.load %arg4[%c0_4, %c0_5] : memref<1x512xf32, #tpu.memory_space<vmem>>, vector<1x512xf32>
    %7 = vector.broadcast %6 : vector<1x512xf32> to vector<8x512xf32>
    %8 = arith.addf %5, %7 : vector<8x512xf32>
    %cst_6 = arith.constant 0.000000e+00 : f32
    %9 = vector.broadcast %cst_6 : f32 to vector<8x512xf32>
    %10 = arith.maximumf %8, %9 : vector<8x512xf32>
    %11 = arith.truncf %10 : vector<8x512xf32> to vector<8x512xbf16>
    %c0_7 = arith.constant 0 : index
    %c0_8 = arith.constant 0 : index
    %12 = vector.load %arg10[%c0_7, %c0_8] : memref<8x128xf32, #tpu.memory_space<vmem>>, vector<8x128xf32>
    %c0_9 = arith.constant 0 : index
    %c0_10 = arith.constant 0 : index
    %13 = vector.load %arg5[%c0_9, %c0_10] : memref<512x128xbf16, #tpu.memory_space<vmem>>, vector<512x128xbf16>
    %cst_11 = arith.constant dense<0.000000e+00> : vector<8x128xf32>
    %14 = tpu.matmul %11, %13, %cst_11 {dimension_numbers = #tpu.dot_dimension_numbers<[1], [0], [0], [1], [0, 0, 1, 1], [], []>} : vector<8x512xbf16>, vector<512x128xbf16>, vector<8x128xf32> -> vector<8x128xf32>
    %15 = arith.addf %12, %14 : vector<8x128xf32>
    %c0_12 = arith.constant 0 : index
    %c0_13 = arith.constant 0 : index
    %16 = vector.load %arg10[%c0_12, %c0_13] : memref<8x128xf32, #tpu.memory_space<vmem>>, vector<8x128xf32>
    tpu.vector_store %arg10[%c0_12, %c0_13], %15 {strides = array<i32>} : memref<8x128xf32, #tpu.memory_space<vmem>>, vector<8x128xf32>,
    %c0_i32_14 = arith.constant 0 : i32
    %17 = arith.cmpi eq, %arg1, %c0_i32_14 : i32
    %18 = arith.extui %17 : i1 to i32
    %c0_i32_15 = arith.constant 0 : i32
    %19 = arith.cmpi ne, %18, %c0_i32_15 : i32
    scf.if %19 {
      %c0_16 = arith.constant 0 : index
      %c0_17 = arith.constant 0 : index
      %20 = vector.load %arg2[%c0_16, %c0_17] : memref<8x128xf32, #tpu.memory_space<vmem>>, vector<8x128xf32>
      %c0_18 = arith.constant 0 : index
      %c0_19 = arith.constant 0 : index
      %21 = vector.load %arg10[%c0_18, %c0_19] : memref<8x128xf32, #tpu.memory_space<vmem>>, vector<8x128xf32>
      %22 = arith.addf %20, %21 : vector<8x128xf32>
      %c0_20 = arith.constant 0 : index
      %c0_21 = arith.constant 0 : index
      %23 = vector.load %arg6[%c0_20, %c0_21] : memref<1x128xf32, #tpu.memory_space<vmem>>, vector<1x128xf32>
      %24 = vector.broadcast %23 : vector<1x128xf32> to vector<8x128xf32>
      %25 = arith.addf %22, %24 : vector<8x128xf32>
      %cst_22 = arith.constant dense<0.000000e+00> : vector<8xf32>
      %26 = vector.multi_reduction <add>, %25, %cst_22 [1] : vector<8x128xf32> to vector<8xf32>
      %27 = vector.shape_cast %26 : vector<8xf32> to vector<8x1xf32>
      %cst_23 = arith.constant 7.812500e-03 : f32
      %28 = vector.broadcast %cst_23 : f32 to vector<8x1xf32>
      %29 = arith.mulf %27, %28 : vector<8x1xf32>
      %30 = vector.broadcast %29 : vector<8x1xf32> to vector<8x128xf32>
      %31 = arith.subf %25, %30 : vector<8x128xf32>
      %32 = arith.mulf %31, %31 : vector<8x128xf32>
      %cst_24 = arith.constant dense<0.000000e+00> : vector<8xf32>
      %33 = vector.multi_reduction <add>, %32, %cst_24 [1] : vector<8x128xf32> to vector<8xf32>
      %34 = vector.shape_cast %33 : vector<8xf32> to vector<8x1xf32>
      %cst_25 = arith.constant 7.812500e-03 : f32
      %35 = vector.broadcast %cst_25 : f32 to vector<8x1xf32>
      %36 = arith.mulf %34, %35 : vector<8x1xf32>
      %cst_26 = arith.constant 9.99999974E-6 : f32
      %37 = vector.broadcast %cst_26 : f32 to vector<8x1xf32>
      %38 = arith.addf %36, %37 : vector<8x1xf32>
      %39 = math.rsqrt %38 : vector<8x1xf32>
      %40 = vector.broadcast %39 : vector<8x1xf32> to vector<8x128xf32>
      %41 = arith.mulf %31, %40 : vector<8x128xf32>
      %c0_27 = arith.constant 0 : index
      %c0_28 = arith.constant 0 : index
      %42 = vector.load %arg7[%c0_27, %c0_28] : memref<1x128xf32, #tpu.memory_space<vmem>>, vector<1x128xf32>
      %43 = vector.broadcast %42 : vector<1x128xf32> to vector<8x128xf32>
      %44 = arith.mulf %41, %43 : vector<8x128xf32>
      %c0_29 = arith.constant 0 : index
      %c0_30 = arith.constant 0 : index
      %45 = vector.load %arg8[%c0_29, %c0_30] : memref<1x128xf32, #tpu.memory_space<vmem>>, vector<1x128xf32>
      %46 = vector.broadcast %45 : vector<1x128xf32> to vector<8x128xf32>
      %47 = arith.addf %44, %46 : vector<8x128xf32>
      %c0_31 = arith.constant 0 : index
      %c0_32 = arith.constant 0 : index
      %48 = vector.load %arg9[%c0_31, %c0_32] : memref<8x128xf32, #tpu.memory_space<vmem>>, vector<8x128xf32>
      tpu.vector_store %arg9[%c0_31, %c0_32], %47 {strides = array<i32>} : memref<8x128xf32, #tpu.memory_space<vmem>>, vector<8x128xf32>,
    } else {
    }
    return
  }
  func.func @transform_0(%arg0: i32, %arg1: i32) -> (i32, i32) {
    %c0_i32 = arith.constant 0 : i32
    %c0_i32_0 = arith.constant 0 : i32
    return %arg0, %c0_i32 : i32, i32
  }
  func.func @transform_1(%arg0: i32, %arg1: i32) -> (i32, i32) {
    %c0_i32 = arith.constant 0 : i32
    %c0_i32_0 = arith.constant 0 : i32
    return %c0_i32, %arg1 : i32, i32
  }
  func.func @transform_2(%arg0: i32, %arg1: i32) -> (i32, i32) {
    %c0_i32 = arith.constant 0 : i32
    %c0_i32_0 = arith.constant 0 : i32
    return %c0_i32, %arg1 : i32, i32
  }
  func.func @transform_3(%arg0: i32, %arg1: i32) -> (i32, i32) {
    %c0_i32 = arith.constant 0 : i32
    %c0_i32_0 = arith.constant 0 : i32
    return %arg1, %c0_i32 : i32, i32
  }
  func.func @transform_4(%arg0: i32, %arg1: i32) -> (i32, i32) {
    %c0_i32 = arith.constant 0 : i32
    %c0_i32_0 = arith.constant 0 : i32
    %c0_i32_1 = arith.constant 0 : i32
    return %c0_i32, %c0_i32_0 : i32, i32
  }
  func.func @transform_5(%arg0: i32, %arg1: i32) -> (i32, i32) {
    %c0_i32 = arith.constant 0 : i32
    %c0_i32_0 = arith.constant 0 : i32
    %c0_i32_1 = arith.constant 0 : i32
    return %c0_i32, %c0_i32_0 : i32, i32
  }
  func.func @transform_6(%arg0: i32, %arg1: i32) -> (i32, i32) {
    %c0_i32 = arith.constant 0 : i32
    %c0_i32_0 = arith.constant 0 : i32
    %c0_i32_1 = arith.constant 0 : i32
    return %c0_i32, %c0_i32_0 : i32, i32
  }
  func.func @transform_7(%arg0: i32, %arg1: i32) -> (i32, i32) {
    %c0_i32 = arith.constant 0 : i32
    %c0_i32_0 = arith.constant 0 : i32
    return %arg0, %c0_i32 : i32, i32
  }
}

</mosaic_0001>

<bundles_post_ra>
// kernel: tpu_custom_call.1
= control target key start
LH: loop header
LB: loop body
LE: loop exit
PB: predicated region body
PF: predicated region fallthrough
CT: control target
= control target key end

     0   :  { %12 = vsyncpa [#allocation5], 0  ;;  %s1990_s0 = inlined_call_operand.hbm [shape: f32[16,128], index: 0, kind: input, shape index: {}]   ;;  %s1991_s1 = inlined_call_operand.hbm [shape: bf16[128,512], index: 1, kind: input, shape index: {}]   ;;  %s1992_s2 = inlined_call_operand.vmem [shape: f32[1,512], index: 2, kind: input, shape index: {}]   ;;  %s1993_s3 = inlined_call_operand.hbm [shape: bf16[512,128], index: 3, kind: input, shape index: {}]   ;;  %s1994_s4 = inlined_call_operand.vmem [shape: f32[1,128], index: 4, kind: input, shape index: {}]   ;;  %s1995_s5 = inlined_call_operand.vmem [shape: f32[1,128], index: 5, kind: input, shape index: {}]   ;;  %s1996_s6 = inlined_call_operand.vmem [shape: f32[1,128], index: 6, kind: input, shape index: {}]   ;;  %s1997_s7 = inlined_call_operand.hbm [shape: f32[16,128], index: 7, kind: output, shape index: {}]  }
   0x1   :  { %14 = vsyncpa [#allocation5 + $0x1], 0 }
   0x2   :  { %15 = vsyncpa [#allocation8], 0 }
   0x3   :  { %16 = vsyncpa [#allocation6], 0 }
   0x4   :  { %18 = vsyncpa [#allocation6 + $0x1], 0  ;;  %s1716_s24 = smov 0   ;;  %s1718_s25 = smov 0  }
   0x5   :  { %s1720_s26 = smov 0   ;;  %s1722_s27 = smov 0  }
   0x6   :  { %s1724_s28 = smov 0   ;;  %s1726_s29 = smov 0  }
   0x7 LB: > { %2004 = sst [smem:[#allocation14_spill]] %s1645_s24  ;;  %s1194_s30 = sadd.s32 4294967295, %s1665_s29   ;;  %s1665_s29 = sphi %s1726_s29, %s24_s29   ;;  %s1661_s28 = sphi %s1724_s28, %s2025_s28   ;;  %s1657_s27 = sphi %s1722_s27, %s2024_s27   ;;  %s1653_s26 = sphi %s1720_s26, %s2023_s26   ;;  %s1649_s25 = sphi %s1718_s25, %s2022_s25   ;;  %s1645_s24 = sphi %s1716_s24, %s2021_s24  }
   0x8   : > { %s1195_s8 = sadd.s32 4294967294, %s1665_s29   ;;  %p56_p0 = scmp.ne.s32.totalorder %s1649_s25, %s1645_s24 }
   0x9   : > { %p1750_p1 = scmp.eq.s32.totalorder %s1194_s30, 0  ;;  %p1754_p2 = scmp.eq.s32.totalorder %s1194_s30, 1 }
   0xa   : > { %p227_p3 = scmp.eq.s32.totalorder %s1195_s8, 1  ;;  %p1196_p5 = scmp.ge.s32.totalorder %s1665_s29, 1 }
   0xb   : > { %s2005_s9 = scalar_select %p1750_p1, 1, 0 }
   0xc   : > { %p1760_p4 = por %p1750_p1, %p56_p0  ;;  %p1765_p6 = por %p227_p3, %p56_p0 }
   0xd   : > { %p234_p7 = scmp.lt.s32.totalorder %s1665_s29, 3  ;;  %s1667_s14 = smov [#allocation7]  }
   0xe   : > { %s2007_s11 = scalar_select %p1760_p4, 1, 0 }
   0xf   : > { %s2008_s12 = scalar_select %p1765_p6, 1, 0 }
  0x10   : > { %p1770_p8 = pnand %p1196_p5, %p234_p7  ;;  %s249_s15 = sshll.u32 %s1667_s14, 4  ;;  %s1774_s15 = int_to_ptr.vmem [resolvable:$true] %s249_s15 }
  0x11   : > { %2009 = sst [smem:[#allocation15_spill]] %s2008_s12  ;;  %s1668_s17 = smov [#allocation9]  }
  0x12   : > { %p1335_p9 = pneg %p1770_p8  ;;  %s273_s18 = sshll.u32 %s1668_s17, 4  ;;  %s1785_s18 = int_to_ptr.vmem [resolvable:$true] %s273_s18 }
  0x13   : > { %s1493_s21 = scalar_lea.hbm %s1991_s1, 4096 }
  0x14   : > { %p1781_p11 = pnand %p1335_p9, %p1750_p1  ;;  %p1494_p12 = scmp.ne.s32.totalorder %s1991_s1, %s1493_s21 }
  0x15   : > { %p1500_p5 = scmp.lt.u32.totalorder %s1493_s21, %s1991_s1 }
  0x16   : > { %p1495_p13 = pneg %p1781_p11 }
  0x18   : > { %p1496_p0 = pnand %p1495_p13, %p1494_p12 }
  0x1a   : > { %p1497_p3 = pneg %p1496_p0 }
  0x1c   : > { %p1502_p7 = pnand %p1500_p5, %p1497_p3 }
  0x1e   : > { %1505 = shalt.err (!%p1502_p7)
}
  0x1f   : > { %s1506_s14 = scalar_lea.vmem %s1774_s15, 4096  ;;  %p1514_p1 = scmp.lt.s32.totalorder %s1774_s15, %s1774_s15 }
  0x20   : > { %p1507_p9 = scmp.ne.s32.totalorder %s1774_s15, %s1506_s14  ;;  %p1515_p12 = scmp.lt.s32.totalorder %s1506_s14, %s1506_s14 }
  0x22   : > { %p1509_p10 = pnand %p1507_p9, %p1495_p13  ;;  %p1516_p0 = por %p1515_p12, %p1514_p1 }
  0x24   : > { %p1510_p6 = pneg %p1509_p10 }
  0x26   : > { %p1517_p4 = pnand %p1516_p0, %p1510_p6 }
  0x28   : > { %1520 = shalt.err (!%p1517_p4)
}
  0x29   : > { %s1669_s17 = smov 256   ;;  %s1670_s19 = smov 16  }
  0x2a   : > { %1338 = dma.hbm_to_vmem [thread:$0]  (!%p1781_p11), %s1991_s1, 4096, %s1774_s15, [#allocation8], %s1669_s17, %s1669_s17, %s1670_s19  }
  0x2b   : > { %s1521_s30 = scalar_lea.hbm %s1993_s3, 4096 }
  0x2c   : > { %p1522_p1 = scmp.ne.s32.totalorder %s1993_s3, %s1521_s30  ;;  %p1528_p10 = scmp.lt.u32.totalorder %s1521_s30, %s1993_s3 }
  0x2e   : > { %p1524_p4 = pnand %p1522_p1, %p1495_p13 }
  0x30   : > { %p1525_p6 = pneg %p1524_p4 }
  0x32   : > { %p1530_p3 = pnand %p1528_p10, %p1525_p6 }
  0x34   : > { %1533 = shalt.err (!%p1530_p3)
}
  0x35   : > { %s1534_s15 = scalar_lea.vmem %s1785_s18, 4096  ;;  %p1542_p12 = scmp.lt.s32.totalorder %s1785_s18, %s1785_s18 }
  0x36   : > { %p1535_p5 = scmp.ne.s32.totalorder %s1785_s18, %s1534_s15  ;;  %p1543_p0 = scmp.lt.s32.totalorder %s1534_s15, %s1534_s15 }
  0x38   : > { %p1537_p7 = pnand %p1535_p5, %p1495_p13  ;;  %p1544_p1 = por %p1543_p0, %p1542_p12 }
  0x3a   : > { %p1538_p9 = pneg %p1537_p7 }
  0x3c   : > { %p1545_p4 = pnand %p1544_p1, %p1538_p9 }
  0x3e   : > { %1548 = shalt.err (!%p1545_p4)
}
  0x3f   : > { %s1671_s24 = smov 64   ;;  %s1672_s12 = smov 4  }
  0x40   : > { %1341 = dma.hbm_to_vmem [thread:$0]  (!%p1781_p11), %s1993_s3, 4096, %s1785_s18, [#allocation8], %s1671_s24, %s1671_s24, %s1672_s12  }
  0x41   : > { %s36_s20 = sadd.s32 1, %s1661_s28  ;;  %s43_s21 = sadd.s32 1, %s1653_s26 }
  0x42   : > { %p38_p13 = scmp.ge.s32.totalorder %s36_s20, 2  ;;  %p50_p6 = scmp.ne.s32.totalorder %s1653_s26, %s1649_s25 }
  0x43   : > { %p51_p10 = scmp.eq.s32.totalorder %s1665_s29, 0  ;;  %p1352_p3 = scmp.lt.s32.totalorder %s1665_s29, 2 }
  0x44   : > { %s2027_s20 = smov (%p38_p13, %s36_s20), 0  ;;  %p1849_p7 = por %p1754_p2, %p50_p6 }
  0x45   : > { %p52_p5 = por %p51_p10, %p50_p6  ;;  %s40_s16 = ssub.s32 %s1661_s28, %s2027_s20 }
  0x46   : > { %s2012_s22 = scalar_select %p1849_p7, 1, 0 }
  0x47   : > { %s296_s23 = sand.u32 1, %s1653_s26   ;;  %p41_p9 = scmp.eq.s32.totalorder %s40_s16, 0 }
  0x48   : > { %s1201_s18 = sshll.u32 %s296_s23, 3  ;;  %s1202_s30 = sshll.u32 %s1661_s28, 7 }
  0x49   : > { %s1858_s8 = scalar_select %p41_p9, %s1653_s26, %s43_s21  }
  0x4a   : > { %s1863_s24 = scalar_lea.hbm %s1990_s0, %s1202_s30  ;;  %s300_s10 = scalar_lea.vmem [#allocation4], %s1201_s18 }
  0x4b   : > { %s307_s12 = sshll.u32 %s300_s10, 4  ;;  %p1867_p2 = pnand %p1352_p3, %p52_p5  ;;  %s1871_s12 = int_to_ptr.vmem [resolvable:$true] %s307_s12 }
  0x4c   : > { %s297_s19 = scalar_lea.sflag [#allocation5], %s296_s23  ;;  %s1549_s21 = scalar_lea.hbm %s1863_s24, 128 }
  0x4d   : > { %p1550_p11 = scmp.ne.s32.totalorder %s1863_s24, %s1549_s21  ;;  %p1551_p12 = pneg %p1867_p2 }
  0x4e   : > { %s1554_s30 = scalar_lea.hbm %s1990_s0, 256  ;;  %p1555_p4 = scmp.lt.u32.totalorder %s1863_s24, %s1990_s0 }
  0x4f   : > { %p1552_p0 = pnand %p1551_p12, %p1550_p11  ;;  %p1556_p13 = scmp.lt.u32.totalorder %s1554_s30, %s1549_s21 }
  0x50   : > { %p1558_p10 = scmp.lt.u32.totalorder %s1549_s21, %s1863_s24 }
  0x51   : > { %p1553_p1 = pneg %p1552_p0  ;;  %p1557_p6 = por %p1556_p13, %p1555_p4 }
  0x53   : > { %p1559_p3 = por %p1558_p10, %p1557_p6 }
  0x55   : > { %p1560_p5 = pnand %p1559_p3, %p1553_p1 }
  0x57   : > { %1563 = shalt.err (!%p1560_p5)
}
  0x58   : > { %s1564_s23 = scalar_lea.vmem %s1871_s12, 128  ;;  %s1673_s10 = smov [#allocation4]  }
  0x59   : > { %p1565_p9 = scmp.ne.s32.totalorder %s1871_s12, %s1564_s23  ;;  %s1569_s16 = sshll.u32 %s1673_s10, 4  ;;  %s1570_s16 = int_to_ptr.vmem [resolvable:$false] %s1569_s16 }
  0x5a   : > { %s1571_s18 = scalar_lea.vmem %s1570_s16, 256  ;;  %p1572_p7 = scmp.lt.s32.totalorder %s1871_s12, %s1570_s16 }
  0x5b   : > { %p1567_p11 = pnand %p1565_p9, %p1551_p12  ;;  %p1573_p4 = scmp.lt.s32.totalorder %s1571_s18, %s1564_s23 }
  0x5d   : > { %p1568_p0 = pneg %p1567_p11  ;;  %p1574_p13 = por %p1573_p4, %p1572_p7 }
  0x5f   : > { %p1575_p6 = pnand %p1574_p13, %p1568_p0 }
  0x61   : > { %1578 = shalt.err (!%p1575_p6)
}
  0x62   : > { %1345 = dma.hbm_to_vmem [thread:$0]  (!%p1867_p2), %s1863_s24, 128, %s1871_s12, %s297_s19  }
  0x63   : > { %316 = sbr.rel (%p1770_p8) target bundleno = 910 (0x38e), region = 48  ;;  %s1901_s21 = sand.u32 (!%p1770_p8), 1, %s1649_s25  }
  0x64   : > { %s1204_s30 = sshll.u32 (!%p1770_p8), %s1901_s21, 3  ;;  %s319_s14 = scalar_lea.sflag (!%p1770_p8), [#allocation5], %s1901_s21 }
  0x65   : > { %s1907_s15 = scalar_lea.vmem (!%p1770_p8), [#allocation4], %s1204_s30  ;;  %p2014_p7 = scmp.ne.s32.totalorder (!%p1770_p8), %s2007_s11, 0 }
  0x6a   : > { %1632 = dma.done.wait (%p2014_p7), %s319_s14, 128  }
  0x6b   : > { %1634 = vsyncadd (%p2014_p7), %s319_s14, 4294967168  ;;  %p2015_p2 = scmp.ne.s32.totalorder %s2005_s9, 0 }
  0x6d   : > { %1636 = dma.done.wait (%p2015_p2), [#allocation8], 8192  }
  0x6e   : > { %1638 = vsyncadd (%p2015_p2), [#allocation8], 4294959104  ;;  %v1674_v0 = vmov 0   ;;  %v1411_v1 = vld [vmem:[#allocation7 + $0x4] ss:$16 sps:$4 sm:$0xff]   ;;  %v1463_v39 = vld [vmem:[#allocation9 + $0x48] sm:$0xff]  }
  0x6f   : > { %628 = vmatprep.mubr.bf16.mxu0 %v1674_v0  ;;  %669 = vmatprep.mubr.bf16.mxu1 %v1674_v0  ;;  %v1413_v2 = vld [vmem:[#allocation7 + $0xc] ss:$16 sps:$4 sm:$0xff]   ;;  %v1415_v3 = vld [vmem:[#allocation7] ss:$16 sps:$4 sm:$0xff]   ;;  %v1416_v4 = vld [vmem:[#allocation7 + $0x8] ss:$16 sps:$4 sm:$0xff]  }
  0x70   : > { %596 = vmatprep.subr.bf16.mxu0 %v1411_v1  ;;  %637 = vmatprep.subr.bf16.mxu1 %v1413_v2  ;;  %v1417_v5 = vld [vmem:[#allocation7 + $0x24] ss:$16 sps:$4 sm:$0xff]   ;;  %v1419_v6 = vld [vmem:[#allocation7 + $0x2c] ss:$16 sps:$4 sm:$0xff]   ;;  %v1421_v7 = vld [vmem:[#allocation7 + $0x20] ss:$16 sps:$4 sm:$0xff]  }
  0x71   : > { %597 = vmatpush1.bf16.msra.mxu0 %v1415_v3  ;;  %638 = vmatpush1.bf16.msra.mxu1 %v1416_v4  ;;  %v1422_v8 = vld [vmem:[#allocation7 + $0x28] ss:$16 sps:$4 sm:$0xff]   ;;  %v1423_v9 = vld [vmem:[#allocation7 + $0x44] ss:$16 sps:$4 sm:$0xff]   ;;  %v1425_v10 = vld [vmem:[#allocation7 + $0x4c] ss:$16 sps:$4 sm:$0xff]   ;;  %v416_v4 = vlaneseq }
  0x72   : > { %598 = vmatprep.subr.bf16.mxu0 %v1417_v5  ;;  %639 = vmatprep.subr.bf16.mxu1 %v1419_v6  ;;  %v1427_v11 = vld [vmem:[#allocation7 + $0x40] ss:$16 sps:$4 sm:$0xff]   ;;  %v1428_v12 = vld [vmem:[#allocation7 + $0x48] ss:$16 sps:$4 sm:$0xff]   ;;  %v1429_v13 = vld [vmem:[#allocation7 + $0x64] ss:$16 sps:$4 sm:$0xff]  }
  0x73   : > { %v1431_v14 = vld [vmem:[#allocation7 + $0x6c] ss:$16 sps:$4 sm:$0xff]   ;;  %v1433_v15 = vld [vmem:[#allocation7 + $0x60] ss:$16 sps:$4 sm:$0xff]   ;;  %v1434_v16 = vld [vmem:[#allocation7 + $0x68] ss:$16 sps:$4 sm:$0xff]  }
  0x74   : > { %v1435_v17 = vld [vmem:[#allocation7 + $0x84] ss:$16 sps:$4 sm:$0xff]   ;;  %v1437_v18 = vld [vmem:[#allocation7 + $0x8c] ss:$16 sps:$4 sm:$0xff]   ;;  %v1439_v19 = vld [vmem:[#allocation7 + $0x80] ss:$16 sps:$4 sm:$0xff]  }
  0x75   : > { %599 = vmatpush1.bf16.msra.mxu0 %v1421_v7  ;;  %640 = vmatpush1.bf16.msra.mxu1 %v1422_v8  ;;  %v1440_v20 = vld [vmem:[#allocation7 + $0x88] ss:$16 sps:$4 sm:$0xff]   ;;  %v1441_v21 = vld [vmem:[#allocation7 + $0xa4] ss:$16 sps:$4 sm:$0xff]   ;;  %v1443_v22 = vld [vmem:[#allocation7 + $0xac] ss:$16 sps:$4 sm:$0xff]  }
  0x76   : > { %600 = vmatprep.subr.bf16.mxu0 %v1423_v9  ;;  %641 = vmatprep.subr.bf16.mxu1 %v1425_v10  ;;  %v1445_v23 = vld [vmem:[#allocation7 + $0xa0] ss:$16 sps:$4 sm:$0xff]   ;;  %v1446_v24 = vld [vmem:[#allocation7 + $0xa8] ss:$16 sps:$4 sm:$0xff]   ;;  %v1447_v25 = vld [vmem:[#allocation7 + $0xc4] ss:$16 sps:$4 sm:$0xff]  }
  0x77   : > { %v1449_v26 = vld [vmem:[#allocation7 + $0xcc] ss:$16 sps:$4 sm:$0xff]   ;;  %v1451_v28 = vld [vmem:[#allocation7 + $0xc0] ss:$16 sps:$4 sm:$0xff]   ;;  %v1452_v30 = vld [vmem:[#allocation7 + $0xc8] ss:$16 sps:$4 sm:$0xff]  }
  0x78   : > { %v1918_v27 = vld [vmem:[%s1907_s15] sm:$0xff]  ;;  %v1459_v35 = vld [vmem:[#allocation9 + $0x40] sm:$0xff]   ;;  %v1464_v41 = vld [vmem:[#allocation9 + $0xc8] sm:$0xff]   ;;  %v417_v5 = vshrl.u32 %v416_v4, 7  ;;  %s1276_s10 = sshll.u32 %s1657_s27, 7  ;;  %s364_s16 = scalar_lea.vmem [#allocation10], %s1204_s30 }
  0x79   : > { %601 = vmatpush1.bf16.msra.mxu0 %v1427_v11  ;;  %642 = vmatpush1.bf16.msra.mxu1 %v1428_v12  ;;  %v379_v29 = vpack.c.bf16 %v1918_v27, %v1918_v27  ;;  %v1453_v31 = vld [vmem:[#allocation7 + $0xe4] ss:$16 sps:$4 sm:$0xff]   ;;  %v1455_v32 = vld [vmem:[#allocation7 + $0xec] ss:$16 sps:$4 sm:$0xff]   ;;  %v1457_v33 = vld [vmem:[#allocation7 + $0xe0] ss:$16 sps:$4 sm:$0xff]   ;;  %s1941_s9 = scalar_lea.hbm %s1997_s7, %s1276_s10 }
  0x7a   : > { %602 = vmatprep.subr.bf16.mxu0 %v1429_v13  ;;  %643 = vmatprep.subr.bf16.mxu1 %v1431_v14  ;;  %v1458_v34 = vld [vmem:[#allocation7 + $0xe8] ss:$16 sps:$4 sm:$0xff]   ;;  %v1460_v36 = vld [vmem:[#allocation9 + $0xc0] sm:$0xff]   ;;  %v1467_v44 = vld [vmem:[#allocation9 + $0x50] sm:$0xff]   ;;  %v418_v6 = vsub.s32 0, %v417_v5  ;;  %v426_v7 = vsub.s32 2, %v417_v5 }
  0x7b   : > { %380 = vst [vmem:[#allocation3] sm:$0xf] %v379_v29  ;;  %v1461_v37 = vld [vmem:[#allocation9] sm:$0xff]   ;;  %v1465_v42 = vld [vmem:[#allocation9 + $0x8] sm:$0xff]   ;;  %v1468_v45 = vld [vmem:[#allocation9 + $0xd0] sm:$0xff]   ;;  %v422_v9 = vsub.s32 1, %v417_v5 }
  0x7c   : > { %v1462_v38 = vld [vmem:[#allocation9 + $0x80] sm:$0xff]   ;;  %v1466_v43 = vld [vmem:[#allocation9 + $0x88] sm:$0xff]   ;;  %v1469_v46 = vld [vmem:[#allocation9 + $0x10] sm:$0xff]   ;;  %v430_v10 = vsub.s32 3, %v417_v5  ;;  %s1081_s18 = sshll.u32 %s364_s16, 4  ;;  %s1068_s11 = scalar_lea.sflag [#allocation6], %s1901_s21  ;;  %s1943_s18 = int_to_ptr.vmem [resolvable:$true] %s1081_s18 }
  0x7d   : > { %603 = vmatpush1.bf16.msra.mxu0 %v1433_v15  ;;  %644 = vmatpush1.bf16.msra.mxu1 %v1434_v16  ;;  %v1470_v47 = vld [vmem:[#allocation9 + $0x90] sm:$0xff]   ;;  %v1471_v48 = vld [vmem:[#allocation9 + $0x58] sm:$0xff]   ;;  %v1475_v52 = vld [vmem:[#allocation9 + $0x60] sm:$0xff]   ;;  %s1579_s13 = scalar_lea.vmem %s1943_s18, 128  ;;  %p2016_p12 = scmp.ne.s32.totalorder %s2012_s22, 0 }
  0x7e   : > { %604 = vmatprep.subr.bf16.mxu0 %v1435_v17  ;;  %645 = vmatprep.subr.bf16.mxu1 %v1437_v18  ;;  %v1472_v49 = vld [vmem:[#allocation9 + $0xd8] sm:$0xff]   ;;  %v1476_v53 = vld [vmem:[#allocation9 + $0xe0] sm:$0xff]   ;;  %v1479_v56 = vld [vmem:[#allocation9 + $0x68] sm:$0xff]   ;;  %p1580_p8 = scmp.ne.s32.totalorder %s1943_s18, %s1579_s13  ;;  %s1675_s27 = smov [#allocation10]  }
  0x7f   : > { %v1473_v50 = vld [vmem:[#allocation9 + $0x18] sm:$0xff]   ;;  %v1477_v54 = vld [vmem:[#allocation9 + $0x20] sm:$0xff]   ;;  %v1480_v57 = vld [vmem:[#allocation9 + $0xe8] sm:$0xff]   ;;  %s1583_s30 = sshll.u32 %s1675_s27, 4  ;;  %s1584_s30 = int_to_ptr.vmem [resolvable:$false] %s1583_s30 }
  0x80   : > { %v1474_v51 = vld [vmem:[#allocation9 + $0x98] sm:$0xff]   ;;  %v1478_v55 = vld [vmem:[#allocation9 + $0xa0] sm:$0xff]   ;;  %v1481_v58 = vld [vmem:[#allocation9 + $0x28] sm:$0xff]   ;;  %p1581_p1 = pnand %p1580_p8, %p2016_p12  ;;  %s1585_s24 = scalar_lea.vmem %s1584_s30, 256 }
  0x81   : > { %605 = vmatpush1.bf16.msra.mxu0 %v1439_v19  ;;  %646 = vmatpush1.bf16.msra.mxu1 %v1440_v20  ;;  %v1482_v59 = vld [vmem:[#allocation9 + $0xa8] sm:$0xff]   ;;  %v1483_v60 = vld [vmem:[#allocation9 + $0x70] sm:$0xff]   ;;  %v1487_v0 = vld [vmem:[#allocation9 + $0x78] sm:$0xff]   ;;  %p1586_p3 = scmp.lt.s32.totalorder %s1943_s18, %s1584_s30  ;;  %p1587_p5 = scmp.lt.s32.totalorder %s1585_s24, %s1579_s13 }
  0x82   : > { %606 = vmatprep.subr.bf16.mxu0 %v1441_v21  ;;  %647 = vmatprep.subr.bf16.mxu1 %v1443_v22  ;;  %v381_v40 = vld [vmem:[#allocation3] sm:$0xf]  ;;  %v1484_v61 = vld [vmem:[#allocation9 + $0xf0] sm:$0xff]   ;;  %v1488_v1 = vld [vmem:[#allocation9 + $0xf8] sm:$0xff]   ;;  %p1582_p10 = pneg %p1581_p1 }
  0x83   : > { %v1485_v62 = vld [vmem:[#allocation9 + $0x30] sm:$0xff]   ;;  %v1489_v2 = vld [vmem:[#allocation9 + $0x38] sm:$0xff]   ;;  %v414_v8 = vld [vmem:[%s1992_s2] sm:$0xf]  ;;  %p1588_p9 = por %p1587_p5, %p1586_p3 }
  0x84   : > { %v1486_v63 = vld [vmem:[#allocation9 + $0xb0] sm:$0xff]   ;;  %v1490_v3 = vld [vmem:[#allocation9 + $0xb8] sm:$0xff]   ;;  %v419_v11 = vrot.slane %v414_v8, %v418_v6  ;;  %v427_v12 = vrot.slane %v414_v8, %v426_v7  ;;  %v423_v13 = vrot.slane %v414_v8, %v422_v9  ;;  %v431_v14 = vrot.slane %v414_v8, %v430_v10 }
  0x85   : > { %607 = vmatpush1.bf16.msra.mxu0 %v1445_v23  ;;  %648 = vmatpush1.bf16.msra.mxu1 %v1446_v24  ;;  %p1589_p11 = pnand %p1588_p9, %p1582_p10 }
  0x86   : > { %608 = vmatprep.subr.bf16.mxu0 %v1447_v25  ;;  %649 = vmatprep.subr.bf16.mxu1 %v1449_v26 }
  0x89   : > { %609 = vmatpush1.bf16.msra.mxu0 %v1451_v28  ;;  %650 = vmatpush1.bf16.msra.mxu1 %v1452_v30 }
  0x8a   : > { %610 = vmatprep.subr.bf16.mxu0 %v1453_v31  ;;  %651 = vmatprep.subr.bf16.mxu1 %v1455_v32 }
  0x8d   : > { %611 = vmatpush1.bf16.msra.mxu0 %v1457_v33  ;;  %652 = vmatpush1.bf16.msra.mxu1 %v1458_v34 }
  0x8e   : > { %1279 = vmatprep.subr.bf16.mxu0 %v1459_v35  ;;  %1301 = vmatprep.subr.bf16.mxu1 %v1460_v36 }
  0x90   : > { %629 = vmatmul.mubr.bf16.vlgmr.msra.gmra.mrb[0].mxu0 %v381_v40  ;;  %670 = vmatmul.mubr.bf16.vlgmr.msra.gmra.mrb[0].mxu1 %v381_v40 }
  0x91   : > { %1280 = vmatpush3.bf16.msra.mxu0 %v1461_v37  ;;  %1302 = vmatpush3.bf16.msra.mxu1 %v1462_v38 }
  0x92   : > { %1281 = vmatprep.subr.bf16.mxu0 %v1463_v39  ;;  %1303 = vmatprep.subr.bf16.mxu1 %v1464_v41 }
  0x95   : > { %1282 = vmatpush3.bf16.msra.mxu0 %v1465_v42  ;;  %1304 = vmatpush3.bf16.msra.mxu1 %v1466_v43 }
  0x96   : > { %1283 = vmatprep.subr.bf16.mxu0 %v1467_v44  ;;  %1305 = vmatprep.subr.bf16.mxu1 %v1468_v45 }
  0x99   : > { %1284 = vmatpush3.bf16.msra.mxu0 %v1469_v46  ;;  %1306 = vmatpush3.bf16.msra.mxu1 %v1470_v47  ;;  %v1272_v47 = vld [vmem:[%s1994_s4] ss:$0 sm:$0xff] }
  0x9a   : > { %1285 = vmatprep.subr.bf16.mxu0 %v1471_v48  ;;  %1307 = vmatprep.subr.bf16.mxu1 %v1472_v49 }
  0x9d   : > { %1286 = vmatpush3.bf16.msra.mxu0 %v1473_v50  ;;  %1308 = vmatpush3.bf16.msra.mxu1 %v1474_v51 }
  0x9e   : > { %1287 = vmatprep.subr.bf16.mxu0 %v1475_v52  ;;  %1309 = vmatprep.subr.bf16.mxu1 %v1476_v53 }
  0xa1   : > { %1288 = vmatpush3.bf16.msra.mxu0 %v1477_v54  ;;  %1310 = vmatpush3.bf16.msra.mxu1 %v1478_v55 }
  0xa2   : > { %1289 = vmatprep.subr.bf16.mxu0 %v1479_v56  ;;  %1311 = vmatprep.subr.bf16.mxu1 %v1480_v57 }
  0xa5   : > { %1290 = vmatpush3.bf16.msra.mxu0 %v1481_v58  ;;  %1312 = vmatpush3.bf16.msra.mxu1 %v1482_v59  ;;  %v1274_v59 = vld [vmem:[%s1996_s6] ss:$0 sm:$0xff] }
  0xa6   : > { %1291 = vmatprep.subr.bf16.mxu0 %v1483_v60  ;;  %1313 = vmatprep.subr.bf16.mxu1 %v1484_v61 }
  0xa9   : > { %1292 = vmatpush3.bf16.msra.mxu0 %v1485_v62  ;;  %1314 = vmatpush3.bf16.msra.mxu1 %v1486_v63 }
  0xaa   : > { %1293 = vmatprep.subr.bf16.mxu0 %v1487_v0  ;;  %1315 = vmatprep.subr.bf16.mxu1 %v1488_v1 }
  0xad   : > { %1294 = vmatpush3.bf16.msra.mxu0 %v1489_v2  ;;  %1316 = vmatpush3.bf16.msra.mxu1 %v1490_v3 }
 0x163   : > { %v630_v15 = vpop.f32.mrb[0].mxu0  ;;  %v671_v16 = vpop.f32.mrb[0].mxu1 }
 0x164   : > { %v631_v17 = vadd.f32 %v630_v15, %v419_v11  ;;  %v672_v18 = vadd.f32 %v671_v16, %v427_v12  ;;  %v632_v19 = vpop.f32.mrb[1].mxu0  ;;  %v673_v20 = vpop.f32.mrb[1].mxu1 }
 0x165   : > { %v633_v21 = vadd.f32 %v632_v19, %v423_v13  ;;  %v674_v22 = vadd.f32 %v673_v20, %v431_v14  ;;  %v634_v23 = vpop.f32.mrb[2].mxu0  ;;  %v675_v24 = vpop.f32.mrb[2].mxu1 }
 0x166   : > { %v678_v25 = vmax.f32 %v631_v17, 0.0  ;;  %v680_v26 = vmax.f32 %v672_v18, 0.0  ;;  %v635_v28 = vpop.f32.mrb[3].mxu0  ;;  %v676_v29 = vpop.f32.mrb[3].mxu1 }
 0x167   : > { %v679_v30 = vmax.f32 %v633_v21, 0.0  ;;  %v681_v31 = vmax.f32 %v674_v22, 0.0 }
 0x168   : > { %v682_v34 = vpack.c.bf16 %v678_v25, %v678_v25  ;;  %v684_v35 = vpack.c.bf16 %v680_v26, %v680_v26 }
 0x169   : > { %v683_v32 = vpack.c.bf16 %v679_v30, %v679_v30  ;;  %v685_v33 = vpack.c.bf16 %v681_v31, %v681_v31 }
 0x16b   : > { %975 = vmatprep.mubr.bf16.mxu0 %v683_v32  ;;  %1015 = vmatprep.mubr.bf16.mxu1 %v685_v33 }
 0x16c   : > { %976 = vmatmul.mubr.bf16.vlgmr.msra.gmra.mrb[4].mxu0 %v682_v34  ;;  %1016 = vmatmul.mubr.bf16.vlgmr.msra.gmra.mrb[4].mxu1 %v684_v35 }
 0x23f   : > { %v1295_v36 = vpop.f32.mrb[4].mxu0  ;;  %v1317_v37 = vpop.f32.mrb[4].mxu1 }
 0x240   : > { %v1296_v38 = vpop.f32.mrb[5].mxu0  ;;  %v1318_v39 = vpop.f32.mrb[5].mxu1 }
 0x241   : > { %v1297_v40 = vadd.f32 %v1296_v38, %v1295_v36  ;;  %v1319_v41 = vadd.f32 %v1318_v39, %v1317_v37  ;;  %v1298_v42 = vpop.f32.mrb[6].mxu0  ;;  %v1320_v43 = vpop.f32.mrb[6].mxu1 }
 0x242   : > { %v1299_v44 = vpop.f32.mrb[7].mxu0  ;;  %v1321_v45 = vpop.f32.mrb[7].mxu1 }
 0x243   : > { %v1018_v46 = vadd.f32 %v1319_v41, %v1297_v40 }
 0x245   : > { %v1030_v48 = vadd.f32 %v1018_v46, %v1918_v27  ;;  %v1273_v27 = vld [vmem:[%s1995_s5] ss:$0 sm:$0xff] }
 0x247   : > { %v1038_v49 = vadd.f32 %v1272_v47, %v1030_v48 }
 0x249   : > { %1039 = vadd.xlane.f32.xlu0 %v1038_v49 }
 0x2d6   : > { %v1040_v50 = vpop.xlane.xlu0 %1039 }
 0x2d7   : > { %v1041_v51 = vmul.f32 0.0078125, %v1040_v50 }
 0x2d9   : > { %v1042_v52 = vsub.f32 %v1038_v49, %v1041_v51 }
 0x2db   : > { %v1043_v53 = vmul.f32 %v1042_v52, %v1042_v52 }
 0x2dd   : > { %1044 = vadd.xlane.f32.xlu0 %v1043_v53 }
 0x36a   : > { %v1045_v54 = vpop.xlane.xlu0 %1044 }
 0x36b   : > { %v1046_v55 = vmul.f32 0.0078125, %v1045_v54 }
 0x36d   : > { %v1047_v56 = vadd.f32 1e-05, %v1046_v55 }
 0x36f   : > { %1491 = vrsqrt.f32 %v1047_v56 }
 0x379   : > { %v1492_v57 = vpop.eup %1491 }
 0x37a   : > { %v1049_v58 = vmul.f32 %v1492_v57, %v1042_v52 }
 0x37c   : > { %v1057_v60 = vmul.f32 %v1273_v27, %v1049_v58 }
 0x37e   : > { %v1065_v61 = vadd.f32 %v1274_v59, %v1057_v60 }
 0x380   : > { %1066 = vst [vmem:[%s364_s16] sm:$0xff] %v1065_v61 }
 0x381   : > { %1592 = shalt.err (!%p1589_p11)
}
 0x382   : > { %s1593_s21 = scalar_lea.hbm %s1941_s9, 128  ;;  %s1597_s19 = scalar_lea.hbm %s1997_s7, 256 }
 0x383   : > { %p1594_p0 = scmp.ne.s32.totalorder %s1941_s9, %s1593_s21  ;;  %p1598_p6 = scmp.lt.u32.totalorder %s1941_s9, %s1997_s7 }
 0x384   : > { %p1599_p7 = scmp.lt.u32.totalorder %s1597_s19, %s1593_s21  ;;  %p1601_p8 = scmp.lt.u32.totalorder %s1593_s21, %s1941_s9 }
 0x385   : > { %p1595_p4 = pnand %p1594_p0, %p2016_p12 }
 0x386   : > { %p1600_p2 = por %p1599_p7, %p1598_p6 }
 0x387   : > { %p1596_p13 = pneg %p1595_p4 }
 0x388   : > { %p1602_p1 = por %p1601_p8, %p1600_p2 }
 0x38a   : > { %p1603_p10 = pnand %p1602_p1, %p1596_p13 }
 0x38c   : > { %1606 = shalt.err (!%p1603_p10)
}
 0x38d   : > { %1333 = dma.vmem_to_hbm [thread:$0]  (%p2016_p12), %s1943_s18, 128, %s1941_s9, %s1068_s11  }
 0x38e PF: > { %s2017_s16 = sld [smem:[#allocation14_spill]]  ;;  %s2018_s14 = sld [smem:[#allocation15_spill]] }
 0x38f   : > { %p2020_p5 = scmp.ge.s32.totalorder %s1665_s29, 2 }
 0x394   : > { %s1093_s15 = sand.u32 1, %s2017_s16   ;;  %p2019_p3 = scmp.ne.s32.totalorder %s2018_s14, 0 }
 0x395   : > { %s1094_s13 = scalar_lea.sflag [#allocation6], %s1093_s15 }
 0x396   : > { %p1347_p9 = pnand %p2020_p5, %p2019_p3 }
 0x398   : > { %1640 = dma.done.wait (!%p1347_p9), %s1094_s13, 128  }
 0x399   : > { %1642 = vsyncadd (!%p1347_p9), %s1094_s13, 4294967168  ;;  %s24_s29 = sadd.s32 1, %s1665_s29   ;;  %s2021_s24 = smov %s1649_s25 }
 0x39a   : > { %p21_p11 = scmp.ge.s32.totalorder %s24_s29, 4   ;;  %s2022_s25 = smov %s1653_s26 }
 0x39b   : > { %s2023_s26 = smov %s1858_s8  ;;  %s2024_s27 = smov %s1661_s28 }
 0x39c   : > { %s2025_s28 = smov %s2027_s20  ;;  %23 = sbr.rel (!%p21_p11) target bundleno = 7 (0x7), region = 114 }
 0x3a3   :  { %1099 = vsyncpa [#allocation5], 1 }
 0x3a4   :  { %1101 = vsyncpa [#allocation5 + $0x1], 1 }
 0x3a5   :  { %1102 = vsyncpa [#allocation8], 1 }
 0x3a6   :  { %1103 = vsyncpa [#allocation6], 1 }
 0x3a7   :  { %1105 = vsyncpa [#allocation6 + $0x1], 1 }

// kernel: tpu_custom_call.1
= control target key start
LH: loop header
LB: loop body
LE: loop exit
PB: predicated region body
PF: predicated region fallthrough
CT: control target
= control target key end

     0   :  { %12 = vsyncpa [#allocation5], 0  ;;  %s1990_s0 = inlined_call_operand.hbm [shape: f32[16,128], index: 0, kind: input, shape index: {}]   ;;  %s1991_s1 = inlined_call_operand.hbm [shape: bf16[128,512], index: 1, kind: input, shape index: {}]   ;;  %s1992_s2 = inlined_call_operand.vmem [shape: f32[1,512], index: 2, kind: input, shape index: {}]   ;;  %s1993_s3 = inlined_call_operand.hbm [shape: bf16[512,128], index: 3, kind: input, shape index: {}]   ;;  %s1994_s4 = inlined_call_operand.vmem [shape: f32[1,128], index: 4, kind: input, shape index: {}]   ;;  %s1995_s5 = inlined_call_operand.vmem [shape: f32[1,128], index: 5, kind: input, shape index: {}]   ;;  %s1996_s6 = inlined_call_operand.vmem [shape: f32[1,128], index: 6, kind: input, shape index: {}]   ;;  %s1997_s7 = inlined_call_operand.hbm [shape: f32[16,128], index: 7, kind: output, shape index: {}]  }
   0x1   :  { %14 = vsyncpa [#allocation5 + $0x1], 0 }
   0x2   :  { %15 = vsyncpa [#allocation8], 0 }
   0x3   :  { %16 = vsyncpa [#allocation6], 0 }
   0x4   :  { %18 = vsyncpa [#allocation6 + $0x1], 0  ;;  %s1716_s24 = smov 0   ;;  %s1718_s25 = smov 0  }
   0x5   :  { %s1720_s26 = smov 0   ;;  %s1722_s27 = smov 0  }
   0x6   :  { %s1724_s28 = smov 0   ;;  %s1726_s29 = smov 0  }
   0x7 LB: > { %2004 = sst [smem:[#allocation14_spill]] %s1645_s24  ;;  %s1194_s30 = sadd.s32 4294967295, %s1665_s29   ;;  %s1665_s29 = sphi %s1726_s29, %s24_s29   ;;  %s1661_s28 = sphi %s1724_s28, %s2025_s28   ;;  %s1657_s27 = sphi %s1722_s27, %s2024_s27   ;;  %s1653_s26 = sphi %s1720_s26, %s2023_s26   ;;  %s1649_s25 = sphi %s1718_s25, %s2022_s25   ;;  %s1645_s24 = sphi %s1716_s24, %s2021_s24  }
   0x8   : > { %s1195_s8 = sadd.s32 4294967294, %s1665_s29   ;;  %p56_p0 = scmp.ne.s32.totalorder %s1649_s25, %s1645_s24 }
   0x9   : > { %p1750_p1 = scmp.eq.s32.totalorder %s1194_s30, 0  ;;  %p1754_p2 = scmp.eq.s32.totalorder %s1194_s30, 1 }
   0xa   : > { %p227_p3 = scmp.eq.s32.totalorder %s1195_s8, 1  ;;  %p1196_p5 = scmp.ge.s32.totalorder %s1665_s29, 1 }
   0xb   : > { %s2005_s9 = scalar_select %p1750_p1, 1, 0 }
   0xc   : > { %p1760_p4 = por %p1750_p1, %p56_p0  ;;  %p1765_p6 = por %p227_p3, %p56_p0 }
   0xd   : > { %p234_p7 = scmp.lt.s32.totalorder %s1665_s29, 3  ;;  %s1667_s14 = smov [#allocation7]  }
   0xe   : > { %s2007_s11 = scalar_select %p1760_p4, 1, 0 }
   0xf   : > { %s2008_s12 = scalar_select %p1765_p6, 1, 0 }
  0x10   : > { %p1770_p8 = pnand %p1196_p5, %p234_p7  ;;  %s249_s15 = sshll.u32 %s1667_s14, 4  ;;  %s1774_s15 = int_to_ptr.vmem [resolvable:$true] %s249_s15 }
  0x11   : > { %2009 = sst [smem:[#allocation15_spill]] %s2008_s12  ;;  %s1668_s17 = smov [#allocation9]  }
  0x12   : > { %p1335_p9 = pneg %p1770_p8  ;;  %s273_s18 = sshll.u32 %s1668_s17, 4  ;;  %s1785_s18 = int_to_ptr.vmem [resolvable:$true] %s273_s18 }
  0x13   : > { %s1493_s21 = scalar_lea.hbm %s1991_s1, 4096 }
  0x14   : > { %p1781_p11 = pnand %p1335_p9, %p1750_p1  ;;  %p1494_p12 = scmp.ne.s32.totalorder %s1991_s1, %s1493_s21 }
  0x15   : > { %p1500_p5 = scmp.lt.u32.totalorder %s1493_s21, %s1991_s1 }
  0x16   : > { %p1495_p13 = pneg %p1781_p11 }
  0x18   : > { %p1496_p0 = pnand %p1495_p13, %p1494_p12 }
  0x1a   : > { %p1497_p3 = pneg %p1496_p0 }
  0x1c   : > { %p1502_p7 = pnand %p1500_p5, %p1497_p3 }
  0x1e   : > { %1505 = shalt.err (!%p1502_p7)
}
  0x1f   : > { %s1506_s14 = scalar_lea.vmem %s1774_s15, 4096  ;;  %p1514_p1 = scmp.lt.s32.totalorder %s1774_s15, %s1774_s15 }
  0x20   : > { %p1507_p9 = scmp.ne.s32.totalorder %s1774_s15, %s1506_s14  ;;  %p1515_p12 = scmp.lt.s32.totalorder %s1506_s14, %s1506_s14 }
  0x22   : > { %p1509_p10 = pnand %p1507_p9, %p1495_p13  ;;  %p1516_p0 = por %p1515_p12, %p1514_p1 }
  0x24   : > { %p1510_p6 = pneg %p1509_p10 }
  0x26   : > { %p1517_p4 = pnand %p1516_p0, %p1510_p6 }
  0x28   : > { %1520 = shalt.err (!%p1517_p4)
}
  0x29   : > { %s1669_s17 = smov 256   ;;  %s1670_s19 = smov 16  }
  0x2a   : > { %1338 = dma.hbm_to_vmem [thread:$0]  (!%p1781_p11), %s1991_s1, 4096, %s1774_s15, [#allocation8], %s1669_s17, %s1669_s17, %s1670_s19  }
  0x2b   : > { %s1521_s30 = scalar_lea.hbm %s1993_s3, 4096 }
  0x2c   : > { %p1522_p1 = scmp.ne.s32.totalorder %s1993_s3, %s1521_s30  ;;  %p1528_p10 = scmp.lt.u32.totalorder %s1521_s30, %s1993_s3 }
  0x2e   : > { %p1524_p4 = pnand %p1522_p1, %p1495_p13 }
  0x30   : > { %p1525_p6 = pneg %p1524_p4 }
  0x32   : > { %p1530_p3 = pnand %p1528_p10, %p1525_p6 }
  0x34   : > { %1533 = shalt.err (!%p1530_p3)
}
  0x35   : > { %s1534_s15 = scalar_lea.vmem %s1785_s18, 4096  ;;  %p1542_p12 = scmp.lt.s32.totalorder %s1785_s18, %s1785_s18 }
  0x36   : > { %p1535_p5 = scmp.ne.s32.totalorder %s1785_s18, %s1534_s15  ;;  %p1543_p0 = scmp.lt.s32.totalorder %s1534_s15, %s1534_s15 }
  0x38   : > { %p1537_p7 = pnand %p1535_p5, %p1495_p13  ;;  %p1544_p1 = por %p1543_p0, %p1542_p12 }
  0x3a   : > { %p1538_p9 = pneg %p1537_p7 }
  0x3c   : > { %p1545_p4 = pnand %p1544_p1, %p1538_p9 }
  0x3e   : > { %1548 = shalt.err (!%p1545_p4)
}
  0x3f   : > { %s1671_s24 = smov 64   ;;  %s1672_s12 = smov 4  }
  0x40   : > { %1341 = dma.hbm_to_vmem [thread:$0]  (!%p1781_p11), %s1993_s3, 4096, %s1785_s18, [#allocation8], %s1671_s24, %s1671_s24, %s1672_s12  }
  0x41   : > { %s36_s20 = sadd.s32 1, %s1661_s28  ;;  %s43_s21 = sadd.s32 1, %s1653_s26 }
  0x42   : > { %p38_p13 = scmp.ge.s32.totalorder %s36_s20, 2  ;;  %p50_p6 = scmp.ne.s32.totalorder %s1653_s26, %s1649_s25 }
  0x43   : > { %p51_p10 = scmp.eq.s32.totalorder %s1665_s29, 0  ;;  %p1352_p3 = scmp.lt.s32.totalorder %s1665_s29, 2 }
  0x44   : > { %s2027_s20 = smov (%p38_p13, %s36_s20), 0  ;;  %p1849_p7 = por %p1754_p2, %p50_p6 }
  0x45   : > { %p52_p5 = por %p51_p10, %p50_p6  ;;  %s40_s16 = ssub.s32 %s1661_s28, %s2027_s20 }
  0x46   : > { %s2012_s22 = scalar_select %p1849_p7, 1, 0 }
  0x47   : > { %s296_s23 = sand.u32 1, %s1653_s26   ;;  %p41_p9 = scmp.eq.s32.totalorder %s40_s16, 0 }
  0x48   : > { %s1201_s18 = sshll.u32 %s296_s23, 3  ;;  %s1202_s30 = sshll.u32 %s1661_s28, 7 }
  0x49   : > { %s1858_s8 = scalar_select %p41_p9, %s1653_s26, %s43_s21  }
  0x4a   : > { %s1863_s24 = scalar_lea.hbm %s1990_s0, %s1202_s30  ;;  %s300_s10 = scalar_lea.vmem [#allocation4], %s1201_s18 }
  0x4b   : > { %s307_s12 = sshll.u32 %s300_s10, 4  ;;  %p1867_p2 = pnand %p1352_p3, %p52_p5  ;;  %s1871_s12 = int_to_ptr.vmem [resolvable:$true] %s307_s12 }
  0x4c   : > { %s297_s19 = scalar_lea.sflag [#allocation5], %s296_s23  ;;  %s1549_s21 = scalar_lea.hbm %s1863_s24, 128 }
  0x4d   : > { %p1550_p11 = scmp.ne.s32.totalorder %s1863_s24, %s1549_s21  ;;  %p1551_p12 = pneg %p1867_p2 }
  0x4e   : > { %s1554_s30 = scalar_lea.hbm %s1990_s0, 256  ;;  %p1555_p4 = scmp.lt.u32.totalorder %s1863_s24, %s1990_s0 }
  0x4f   : > { %p1552_p0 = pnand %p1551_p12, %p1550_p11  ;;  %p1556_p13 = scmp.lt.u32.totalorder %s1554_s30, %s1549_s21 }
  0x50   : > { %p1558_p10 = scmp.lt.u32.totalorder %s1549_s21, %s1863_s24 }
  0x51   : > { %p1553_p1 = pneg %p1552_p0  ;;  %p1557_p6 = por %p1556_p13, %p1555_p4 }
  0x53   : > { %p1559_p3 = por %p1558_p10, %p1557_p6 }
  0x55   : > { %p1560_p5 = pnand %p1559_p3, %p1553_p1 }
  0x57   : > { %1563 = shalt.err (!%p1560_p5)
}
  0x58   : > { %s1564_s23 = scalar_lea.vmem %s1871_s12, 128  ;;  %s1673_s10 = smov [#allocation4]  }
  0x59   : > { %p1565_p9 = scmp.ne.s32.totalorder %s1871_s12, %s1564_s23  ;;  %s1569_s16 = sshll.u32 %s1673_s10, 4  ;;  %s1570_s16 = int_to_ptr.vmem [resolvable:$false] %s1569_s16 }
  0x5a   : > { %s1571_s18 = scalar_lea.vmem %s1570_s16, 256  ;;  %p1572_p7 = scmp.lt.s32.totalorder %s1871_s12, %s1570_s16 }
  0x5b   : > { %p1567_p11 = pnand %p1565_p9, %p1551_p12  ;;  %p1573_p4 = scmp.lt.s32.totalorder %s1571_s18, %s1564_s23 }
  0x5d   : > { %p1568_p0 = pneg %p1567_p11  ;;  %p1574_p13 = por %p1573_p4, %p1572_p7 }
  0x5f   : > { %p1575_p6 = pnand %p1574_p13, %p1568_p0 }
  0x61   : > { %1578 = shalt.err (!%p1575_p6)
}
  0x62   : > { %1345 = dma.hbm_to_vmem [thread:$0]  (!%p1867_p2), %s1863_s24, 128, %s1871_s12, %s297_s19  }
  0x63   : > { %316 = sbr.rel (%p1770_p8) target bundleno = 910 (0x38e), region = 48  ;;  %s1901_s21 = sand.u32 (!%p1770_p8), 1, %s1649_s25  }
  0x64   : > { %s1204_s30 = sshll.u32 (!%p1770_p8), %s1901_s21, 3  ;;  %s319_s14 = scalar_lea.sflag (!%p1770_p8), [#allocation5], %s1901_s21 }
  0x65   : > { %s1907_s15 = scalar_lea.vmem (!%p1770_p8), [#allocation4], %s1204_s30  ;;  %p2014_p7 = scmp.ne.s32.totalorder (!%p1770_p8), %s2007_s11, 0 }
  0x6a   : > { %1632 = dma.done.wait (%p2014_p7), %s319_s14, 128  }
  0x6b   : > { %1634 = vsyncadd (%p2014_p7), %s319_s14, 4294967168  ;;  %p2015_p2 = scmp.ne.s32.totalorder %s2005_s9, 0 }
  0x6d   : > { %1636 = dma.done.wait (%p2015_p2), [#allocation8], 8192  }
  0x6e   : > { %1638 = vsyncadd (%p2015_p2), [#allocation8], 4294959104  ;;  %v1674_v0 = vmov 0   ;;  %v1411_v1 = vld [vmem:[#allocation7 + $0x4] ss:$16 sps:$4 sm:$0xff]   ;;  %v1463_v39 = vld [vmem:[#allocation9 + $0x48] sm:$0xff]  }
  0x6f   : > { %628 = vmatprep.mubr.bf16.mxu0 %v1674_v0  ;;  %669 = vmatprep.mubr.bf16.mxu1 %v1674_v0  ;;  %v1413_v2 = vld [vmem:[#allocation7 + $0xc] ss:$16 sps:$4 sm:$0xff]   ;;  %v1415_v3 = vld [vmem:[#allocation7] ss:$16 sps:$4 sm:$0xff]   ;;  %v1416_v4 = vld [vmem:[#allocation7 + $0x8] ss:$16 sps:$4 sm:$0xff]  }
  0x70   : > { %596 = vmatprep.subr.bf16.mxu0 %v1411_v1  ;;  %637 = vmatprep.subr.bf16.mxu1 %v1413_v2  ;;  %v1417_v5 = vld [vmem:[#allocation7 + $0x24] ss:$16 sps:$4 sm:$0xff]   ;;  %v1419_v6 = vld [vmem:[#allocation7 + $0x2c] ss:$16 sps:$4 sm:$0xff]   ;;  %v1421_v7 = vld [vmem:[#allocation7 + $0x20] ss:$16 sps:$4 sm:$0xff]  }
  0x71   : > { %597 = vmatpush1.bf16.msra.mxu0 %v1415_v3  ;;  %638 = vmatpush1.bf16.msra.mxu1 %v1416_v4  ;;  %v1422_v8 = vld [vmem:[#allocation7 + $0x28] ss:$16 sps:$4 sm:$0xff]   ;;  %v1423_v9 = vld [vmem:[#allocation7 + $0x44] ss:$16 sps:$4 sm:$0xff]   ;;  %v1425_v10 = vld [vmem:[#allocation7 + $0x4c] ss:$16 sps:$4 sm:$0xff]   ;;  %v416_v4 = vlaneseq }
  0x72   : > { %598 = vmatprep.subr.bf16.mxu0 %v1417_v5  ;;  %639 = vmatprep.subr.bf16.mxu1 %v1419_v6  ;;  %v1427_v11 = vld [vmem:[#allocation7 + $0x40] ss:$16 sps:$4 sm:$0xff]   ;;  %v1428_v12 = vld [vmem:[#allocation7 + $0x48] ss:$16 sps:$4 sm:$0xff]   ;;  %v1429_v13 = vld [vmem:[#allocation7 + $0x64] ss:$16 sps:$4 sm:$0xff]  }
  0x73   : > { %v1431_v14 = vld [vmem:[#allocation7 + $0x6c] ss:$16 sps:$4 sm:$0xff]   ;;  %v1433_v15 = vld [vmem:[#allocation7 + $0x60] ss:$16 sps:$4 sm:$0xff]   ;;  %v1434_v16 = vld [vmem:[#allocation7 + $0x68] ss:$16 sps:$4 sm:$0xff]  }
  0x74   : > { %v1435_v17 = vld [vmem:[#allocation7 + $0x84] ss:$16 sps:$4 sm:$0xff]   ;;  %v1437_v18 = vld [vmem:[#allocation7 + $0x8c] ss:$16 sps:$4 sm:$0xff]   ;;  %v1439_v19 = vld [vmem:[#allocation7 + $0x80] ss:$16 sps:$4 sm:$0xff]  }
  0x75   : > { %599 = vmatpush1.bf16.msra.mxu0 %v1421_v7  ;;  %640 = vmatpush1.bf16.msra.mxu1 %v1422_v8  ;;  %v1440_v20 = vld [vmem:[#allocation7 + $0x88] ss:$16 sps:$4 sm:$0xff]   ;;  %v1441_v21 = vld [vmem:[#allocation7 + $0xa4] ss:$16 sps:$4 sm:$0xff]   ;;  %v1443_v22 = vld [vmem:[#allocation7 + $0xac] ss:$16 sps:$4 sm:$0xff]  }
  0x76   : > { %600 = vmatprep.subr.bf16.mxu0 %v1423_v9  ;;  %641 = vmatprep.subr.bf16.mxu1 %v1425_v10  ;;  %v1445_v23 = vld [vmem:[#allocation7 + $0xa0] ss:$16 sps:$4 sm:$0xff]   ;;  %v1446_v24 = vld [vmem:[#allocation7 + $0xa8] ss:$16 sps:$4 sm:$0xff]   ;;  %v1447_v25 = vld [vmem:[#allocation7 + $0xc4] ss:$16 sps:$4 sm:$0xff]  }
  0x77   : > { %v1449_v26 = vld [vmem:[#allocation7 + $0xcc] ss:$16 sps:$4 sm:$0xff]   ;;  %v1451_v28 = vld [vmem:[#allocation7 + $0xc0] ss:$16 sps:$4 sm:$0xff]   ;;  %v1452_v30 = vld [vmem:[#allocation7 + $0xc8] ss:$16 sps:$4 sm:$0xff]  }
  0x78   : > { %v1918_v27 = vld [vmem:[%s1907_s15] sm:$0xff]  ;;  %v1459_v35 = vld [vmem:[#allocation9 + $0x40] sm:$0xff]   ;;  %v1464_v41 = vld [vmem:[#allocation9 + $0xc8] sm:$0xff]   ;;  %v417_v5 = vshrl.u32 %v416_v4, 7  ;;  %s1276_s10 = sshll.u32 %s1657_s27, 7  ;;  %s364_s16 = scalar_lea.vmem [#allocation10], %s1204_s30 }
  0x79   : > { %601 = vmatpush1.bf16.msra.mxu0 %v1427_v11  ;;  %642 = vmatpush1.bf16.msra.mxu1 %v1428_v12  ;;  %v379_v29 = vpack.c.bf16 %v1918_v27, %v1918_v27  ;;  %v1453_v31 = vld [vmem:[#allocation7 + $0xe4] ss:$16 sps:$4 sm:$0xff]   ;;  %v1455_v32 = vld [vmem:[#allocation7 + $0xec] ss:$16 sps:$4 sm:$0xff]   ;;  %v1457_v33 = vld [vmem:[#allocation7 + $0xe0] ss:$16 sps:$4 sm:$0xff]   ;;  %s1941_s9 = scalar_lea.hbm %s1997_s7, %s1276_s10 }
  0x7a   : > { %602 = vmatprep.subr.bf16.mxu0 %v1429_v13  ;;  %643 = vmatprep.subr.bf16.mxu1 %v1431_v14  ;;  %v1458_v34 = vld [vmem:[#allocation7 + $0xe8] ss:$16 sps:$4 sm:$0xff]   ;;  %v1460_v36 = vld [vmem:[#allocation9 + $0xc0] sm:$0xff]   ;;  %v1467_v44 = vld [vmem:[#allocation9 + $0x50] sm:$0xff]   ;;  %v418_v6 = vsub.s32 0, %v417_v5  ;;  %v426_v7 = vsub.s32 2, %v417_v5 }
  0x7b   : > { %380 = vst [vmem:[#allocation3] sm:$0xf] %v379_v29  ;;  %v1461_v37 = vld [vmem:[#allocation9] sm:$0xff]   ;;  %v1465_v42 = vld [vmem:[#allocation9 + $0x8] sm:$0xff]   ;;  %v1468_v45 = vld [vmem:[#allocation9 + $0xd0] sm:$0xff]   ;;  %v422_v9 = vsub.s32 1, %v417_v5 }
  0x7c   : > { %v1462_v38 = vld [vmem:[#allocation9 + $0x80] sm:$0xff]   ;;  %v1466_v43 = vld [vmem:[#allocation9 + $0x88] sm:$0xff]   ;;  %v1469_v46 = vld [vmem:[#allocation9 + $0x10] sm:$0xff]   ;;  %v430_v10 = vsub.s32 3, %v417_v5  ;;  %s1081_s18 = sshll.u32 %s364_s16, 4  ;;  %s1068_s11 = scalar_lea.sflag [#allocation6], %s1901_s21  ;;  %s1943_s18 = int_to_ptr.vmem [resolvable:$true] %s1081_s18 }
  0x7d   : > { %603 = vmatpush1.bf16.msra.mxu0 %v1433_v15  ;;  %644 = vmatpush1.bf16.msra.mxu1 %v1434_v16  ;;  %v1470_v47 = vld [vmem:[#allocation9 + $0x90] sm:$0xff]   ;;  %v1471_v48 = vld [vmem:[#allocation9 + $0x58] sm:$0xff]   ;;  %v1475_v52 = vld [vmem:[#allocation9 + $0x60] sm:$0xff]   ;;  %s1579_s13 = scalar_lea.vmem %s1943_s18, 128  ;;  %p2016_p12 = scmp.ne.s32.totalorder %s2012_s22, 0 }
  0x7e   : > { %604 = vmatprep.subr.bf16.mxu0 %v1435_v17  ;;  %645 = vmatprep.subr.bf16.mxu1 %v1437_v18  ;;  %v1472_v49 = vld [vmem:[#allocation9 + $0xd8] sm:$0xff]   ;;  %v1476_v53 = vld [vmem:[#allocation9 + $0xe0] sm:$0xff]   ;;  %v1479_v56 = vld [vmem:[#allocation9 + $0x68] sm:$0xff]   ;;  %p1580_p8 = scmp.ne.s32.totalorder %s1943_s18, %s1579_s13  ;;  %s1675_s27 = smov [#allocation10]  }
  0x7f   : > { %v1473_v50 = vld [vmem:[#allocation9 + $0x18] sm:$0xff]   ;;  %v1477_v54 = vld [vmem:[#allocation9 + $0x20] sm:$0xff]   ;;  %v1480_v57 = vld [vmem:[#allocation9 + $0xe8] sm:$0xff]   ;;  %s1583_s30 = sshll.u32 %s1675_s27, 4  ;;  %s1584_s30 = int_to_ptr.vmem [resolvable:$false] %s1583_s30 }
  0x80   : > { %v1474_v51 = vld [vmem:[#allocation9 + $0x98] sm:$0xff]   ;;  %v1478_v55 = vld [vmem:[#allocation9 + $0xa0] sm:$0xff]   ;;  %v1481_v58 = vld [vmem:[#allocation9 + $0x28] sm:$0xff]   ;;  %p1581_p1 = pnand %p1580_p8, %p2016_p12  ;;  %s1585_s24 = scalar_lea.vmem %s1584_s30, 256 }
  0x81   : > { %605 = vmatpush1.bf16.msra.mxu0 %v1439_v19  ;;  %646 = vmatpush1.bf16.msra.mxu1 %v1440_v20  ;;  %v1482_v59 = vld [vmem:[#allocation9 + $0xa8] sm:$0xff]   ;;  %v1483_v60 = vld [vmem:[#allocation9 + $0x70] sm:$0xff]   ;;  %v1487_v0 = vld [vmem:[#allocation9 + $0x78] sm:$0xff]   ;;  %p1586_p3 = scmp.lt.s32.totalorder %s1943_s18, %s1584_s30  ;;  %p1587_p5 = scmp.lt.s32.totalorder %s1585_s24, %s1579_s13 }
  0x82   : > { %606 = vmatprep.subr.bf16.mxu0 %v1441_v21  ;;  %647 = vmatprep.subr.bf16.mxu1 %v1443_v22  ;;  %v381_v40 = vld [vmem:[#allocation3] sm:$0xf]  ;;  %v1484_v61 = vld [vmem:[#allocation9 + $0xf0] sm:$0xff]   ;;  %v1488_v1 = vld [vmem:[#allocation9 + $0xf8] sm:$0xff]   ;;  %p1582_p10 = pneg %p1581_p1 }
  0x83   : > { %v1485_v62 = vld [vmem:[#allocation9 + $0x30] sm:$0xff]   ;;  %v1489_v2 = vld [vmem:[#allocation9 + $0x38] sm:$0xff]   ;;  %v414_v8 = vld [vmem:[%s1992_s2] sm:$0xf]  ;;  %p1588_p9 = por %p1587_p5, %p1586_p3 }
  0x84   : > { %v1486_v63 = vld [vmem:[#allocation9 + $0xb0] sm:$0xff]   ;;  %v1490_v3 = vld [vmem:[#allocation9 + $0xb8] sm:$0xff]   ;;  %v419_v11 = vrot.slane %v414_v8, %v418_v6  ;;  %v427_v12 = vrot.slane %v414_v8, %v426_v7  ;;  %v423_v13 = vrot.slane %v414_v8, %v422_v9  ;;  %v431_v14 = vrot.slane %v414_v8, %v430_v10 }
  0x85   : > { %607 = vmatpush1.bf16.msra.mxu0 %v1445_v23  ;;  %648 = vmatpush1.bf16.msra.mxu1 %v1446_v24  ;;  %p1589_p11 = pnand %p1588_p9, %p1582_p10 }
  0x86   : > { %608 = vmatprep.subr.bf16.mxu0 %v1447_v25  ;;  %649 = vmatprep.subr.bf16.mxu1 %v1449_v26 }
  0x89   : > { %609 = vmatpush1.bf16.msra.mxu0 %v1451_v28  ;;  %650 = vmatpush1.bf16.msra.mxu1 %v1452_v30 }
  0x8a   : > { %610 = vmatprep.subr.bf16.mxu0 %v1453_v31  ;;  %651 = vmatprep.subr.bf16.mxu1 %v1455_v32 }
  0x8d   : > { %611 = vmatpush1.bf16.msra.mxu0 %v1457_v33  ;;  %652 = vmatpush1.bf16.msra.mxu1 %v1458_v34 }
  0x8e   : > { %1279 = vmatprep.subr.bf16.mxu0 %v1459_v35  ;;  %1301 = vmatprep.subr.bf16.mxu1 %v1460_v36 }
  0x90   : > { %629 = vmatmul.mubr.bf16.vlgmr.msra.gmra.mrb[0].mxu0 %v381_v40  ;;  %670 = vmatmul.mubr.bf16.vlgmr.msra.gmra.mrb[0].mxu1 %v381_v40 }
  0x91   : > { %1280 = vmatpush3.bf16.msra.mxu0 %v1461_v37  ;;  %1302 = vmatpush3.bf16.msra.mxu1 %v1462_v38 }
  0x92   : > { %1281 = vmatprep.subr.bf16.mxu0 %v1463_v39  ;;  %1303 = vmatprep.subr.bf16.mxu1 %v1464_v41 }
  0x95   : > { %1282 = vmatpush3.bf16.msra.mxu0 %v1465_v42  ;;  %1304 = vmatpush3.bf16.msra.mxu1 %v1466_v43 }
  0x96   : > { %1283 = vmatprep.subr.bf16.mxu0 %v1467_v44  ;;  %1305 = vmatprep.subr.bf16.mxu1 %v1468_v45 }
  0x99   : > { %1284 = vmatpush3.bf16.msra.mxu0 %v1469_v46  ;;  %1306 = vmatpush3.bf16.msra.mxu1 %v1470_v47  ;;  %v1272_v47 = vld [vmem:[%s1994_s4] ss:$0 sm:$0xff] }
  0x9a   : > { %1285 = vmatprep.subr.bf16.mxu0 %v1471_v48  ;;  %1307 = vmatprep.subr.bf16.mxu1 %v1472_v49 }
  0x9d   : > { %1286 = vmatpush3.bf16.msra.mxu0 %v1473_v50  ;;  %1308 = vmatpush3.bf16.msra.mxu1 %v1474_v51 }
  0x9e   : > { %1287 = vmatprep.subr.bf16.mxu0 %v1475_v52  ;;  %1309 = vmatprep.subr.bf16.mxu1 %v1476_v53 }
  0xa1   : > { %1288 = vmatpush3.bf16.msra.mxu0 %v1477_v54  ;;  %1310 = vmatpush3.bf16.msra.mxu1 %v1478_v55 }
  0xa2   : > { %1289 = vmatprep.subr.bf16.mxu0 %v1479_v56  ;;  %1311 = vmatprep.subr.bf16.mxu1 %v1480_v57 }
  0xa5   : > { %1290 = vmatpush3.bf16.msra.mxu0 %v1481_v58  ;;  %1312 = vmatpush3.bf16.msra.mxu1 %v1482_v59  ;;  %v1274_v59 = vld [vmem:[%s1996_s6] ss:$0 sm:$0xff] }
  0xa6   : > { %1291 = vmatprep.subr.bf16.mxu0 %v1483_v60  ;;  %1313 = vmatprep.subr.bf16.mxu1 %v1484_v61 }
  0xa9   : > { %1292 = vmatpush3.bf16.msra.mxu0 %v1485_v62  ;;  %1314 = vmatpush3.bf16.msra.mxu1 %v1486_v63 }
  0xaa   : > { %1293 = vmatprep.subr.bf16.mxu0 %v1487_v0  ;;  %1315 = vmatprep.subr.bf16.mxu1 %v1488_v1 }
  0xad   : > { %1294 = vmatpush3.bf16.msra.mxu0 %v1489_v2  ;;  %1316 = vmatpush3.bf16.msra.mxu1 %v1490_v3 }
 0x163   : > { %v630_v15 = vpop.f32.mrb[0].mxu0  ;;  %v671_v16 = vpop.f32.mrb[0].mxu1 }
 0x164   : > { %v631_v17 = vadd.f32 %v630_v15, %v419_v11  ;;  %v672_v18 = vadd.f32 %v671_v16, %v427_v12  ;;  %v632_v19 = vpop.f32.mrb[1].mxu0  ;;  %v673_v20 = vpop.f32.mrb[1].mxu1 }
 0x165   : > { %v633_v21 = vadd.f32 %v632_v19, %v423_v13  ;;  %v674_v22 = vadd.f32 %v673_v20, %v431_v14  ;;  %v634_v23 = vpop.f32.mrb[2].mxu0  ;;  %v675_v24 = vpop.f32.mrb[2].mxu1 }
 0x166   : > { %v678_v25 = vmax.f32 %v631_v17, 0.0  ;;  %v680_v26 = vmax.f32 %v672_v18, 0.0  ;;  %v635_v28 = vpop.f32.mrb[3].mxu0  ;;  %v676_v29 = vpop.f32.mrb[3].mxu1 }
 0x167   : > { %v679_v30 = vmax.f32 %v633_v21, 0.0  ;;  %v681_v31 = vmax.f32 %v674_v22, 0.0 }
 0x168   : > { %v682_v34 = vpack.c.bf16 %v678_v25, %v678_v25  ;;  %v684_v35 = vpack.c.bf16 %v680_v26, %v680_v26 }
 0x169   : > { %v683_v32 = vpack.c.bf16 %v679_v30, %v679_v30  ;;  %v685_v33 = vpack.c.bf16 %v681_v31, %v681_v31 }
 0x16b   : > { %975 = vmatprep.mubr.bf16.mxu0 %v683_v32  ;;  %1015 = vmatprep.mubr.bf16.mxu1 %v685_v33 }
 0x16c   : > { %976 = vmatmul.mubr.bf16.vlgmr.msra.gmra.mrb[4].mxu0 %v682_v34  ;;  %1016 = vmatmul.mubr.bf16.vlgmr.msra.gmra.mrb[4].mxu1 %v684_v35 }
 0x23f   : > { %v1295_v36 = vpop.f32.mrb[4].mxu0  ;;  %v1317_v37 = vpop.f32.mrb[4].mxu1 }
 0x240   : > { %v1296_v38 = vpop.f32.mrb[5].mxu0  ;;  %v1318_v39 = vpop.f32.mrb[5].mxu1 }
 0x241   : > { %v1297_v40 = vadd.f32 %v1296_v38, %v1295_v36  ;;  %v1319_v41 = vadd.f32 %v1318_v39, %v1317_v37  ;;  %v1298_v42 = vpop.f32.mrb[6].mxu0  ;;  %v1320_v43 = vpop.f32.mrb[6].mxu1 }
 0x242   : > { %v1299_v44 = vpop.f32.mrb[7].mxu0  ;;  %v1321_v45 = vpop.f32.mrb[7].mxu1 }
 0x243   : > { %v1018_v46 = vadd.f32 %v1319_v41, %v1297_v40 }
 0x245   : > { %v1030_v48 = vadd.f32 %v1018_v46, %v1918_v27  ;;  %v1273_v27 = vld [vmem:[%s1995_s5] ss:$0 sm:$0xff] }
 0x247   : > { %v1038_v49 = vadd.f32 %v1272_v47, %v1030_v48 }
 0x249   : > { %1039 = vadd.xlane.f32.xlu0 %v1038_v49 }
 0x2d6   : > { %v1040_v50 = vpop.xlane.xlu0 %1039 }
 0x2d7   : > { %v1041_v51 = vmul.f32 0.0078125, %v1040_v50 }
 0x2d9   : > { %v1042_v52 = vsub.f32 %v1038_v49, %v1041_v51 }
 0x2db   : > { %v1043_v53 = vmul.f32 %v1042_v52, %v1042_v52 }
 0x2dd   : > { %1044 = vadd.xlane.f32.xlu0 %v1043_v53 }
 0x36a   : > { %v1045_v54 = vpop.xlane.xlu0 %1044 }
 0x36b   : > { %v1046_v55 = vmul.f32 0.0078125, %v1045_v54 }
 0x36d   : > { %v1047_v56 = vadd.f32 1e-05, %v1046_v55 }
 0x36f   : > { %1491 = vrsqrt.f32 %v1047_v56 }
 0x379   : > { %v1492_v57 = vpop.eup %1491 }
 0x37a   : > { %v1049_v58 = vmul.f32 %v1492_v57, %v1042_v52 }
 0x37c   : > { %v1057_v60 = vmul.f32 %v1273_v27, %v1049_v58 }
 0x37e   : > { %v1065_v61 = vadd.f32 %v1274_v59, %v1057_v60 }
 0x380   : > { %1066 = vst [vmem:[%s364_s16] sm:$0xff] %v1065_v61 }
 0x381   : > { %1592 = shalt.err (!%p1589_p11)
}
 0x382   : > { %s1593_s21 = scalar_lea.hbm %s1941_s9, 128  ;;  %s1597_s19 = scalar_lea.hbm %s1997_s7, 256 }
 0x383   : > { %p1594_p0 = scmp.ne.s32.totalorder %s1941_s9, %s1593_s21  ;;  %p1598_p6 = scmp.lt.u32.totalorder %s1941_s9, %s1997_s7 }
 0x384   : > { %p1599_p7 = scmp.lt.u32.totalorder %s1597_s19, %s1593_s21  ;;  %p1601_p8 = scmp.lt.u32.totalorder %s1593_s21, %s1941_s9 }
 0x385   : > { %p1595_p4 = pnand %p1594_p0, %p2016_p12 }
 0x386   : > { %p1600_p2 = por %p1599_p7, %p1598_p6 }
 0x387   : > { %p1596_p13 = pneg %p1595_p4 }
 0x388   : > { %p1602_p1 = por %p1601_p8, %p1600_p2 }
 0x38a   : > { %p1603_p10 = pnand %p1602_p1, %p1596_p13 }
 0x38c   : > { %1606 = shalt.err (!%p1603_p10)
}
 0x38d   : > { %1333 = dma.vmem_to_hbm [thread:$0]  (%p2016_p12), %s1943_s18, 128, %s1941_s9, %s1068_s11  }
 0x38e PF: > { %s2017_s16 = sld [smem:[#allocation14_spill]]  ;;  %s2018_s14 = sld [smem:[#allocation15_spill]] }
 0x38f   : > { %p2020_p5 = scmp.ge.s32.totalorder %s1665_s29, 2 }
 0x394   : > { %s1093_s15 = sand.u32 1, %s2017_s16   ;;  %p2019_p3 = scmp.ne.s32.totalorder %s2018_s14, 0 }
 0x395   : > { %s1094_s13 = scalar_lea.sflag [#allocation6], %s1093_s15 }
 0x396   : > { %p1347_p9 = pnand %p2020_p5, %p2019_p3 }
 0x398   : > { %1640 = dma.done.wait (!%p1347_p9), %s1094_s13, 128  }
 0x399   : > { %1642 = vsyncadd (!%p1347_p9), %s1094_s13, 4294967168  ;;  %s24_s29 = sadd.s32 1, %s1665_s29   ;;  %s2021_s24 = smov %s1649_s25 }
 0x39a   : > { %p21_p11 = scmp.ge.s32.totalorder %s24_s29, 4   ;;  %s2022_s25 = smov %s1653_s26 }
 0x39b   : > { %s2023_s26 = smov %s1858_s8  ;;  %s2024_s27 = smov %s1661_s28 }
 0x39c   : > { %s2025_s28 = smov %s2027_s20  ;;  %23 = sbr.rel (!%p21_p11) target bundleno = 7 (0x7), region = 114 }
 0x3a3   :  { %1099 = vsyncpa [#allocation5], 1 }
 0x3a4   :  { %1101 = vsyncpa [#allocation5 + $0x1], 1 }
 0x3a5   :  { %1102 = vsyncpa [#allocation8], 1 }
 0x3a6   :  { %1103 = vsyncpa [#allocation6], 1 }
 0x3a7   :  { %1105 = vsyncpa [#allocation6 + $0x1], 1 }

</bundles_post_ra>
